<compile_context>
chip_gen: v7x
topology: tpu7x:2x2x1
jax: 0.10.0
libtpu: 0.0.40
codegen_flags: <defaults>
</compile_context>

<pallas_src>
import functools
import math

import jax
import jax.numpy as jnp
from jax.experimental import pallas as pl
from jax.experimental.pallas import tpu as pltpu


# ------------------------------ in-kernel helpers ------------------------------ #

def _layer_norm(h, g, b, eps):
    # statistics kept in f32 (h is always f32 here)
    mu = jnp.mean(h, axis=-1, keepdims=True)
    var = jnp.mean(jnp.square(h - mu), axis=-1, keepdims=True)
    return (h - mu) * jax.lax.rsqrt(var + eps) * g + b


def _gelu(y):
    # TODO(synk): HF BERT uses exact erf-GELU; tanh approximation kept for Mosaic-safe
    # lowering (the in-file reference uses the same form). Kept in f32 (v5e has no bf16
    # EUP; on v6e/v7x a bf16 tanh would halve EUP pressure if it ever becomes critical).
    c = jnp.float32(math.sqrt(2.0 / math.pi))
    return 0.5 * y * (1.0 + jnp.tanh(c * (y + 0.044715 * y * y * y)))


# --------------------------- fused BERT encoder kernel -------------------------- #

def _bert_encoder_kernel(
        x_ref, bias_ref, emb_g_ref, emb_b_ref,
        wqkv_ref, bqkv_ref, wo_ref, bo_ref, ln1_g_ref, ln1_b_ref,
        wi_ref, bi_ref, wf_ref, bf_ref, ln2_g_ref, ln2_b_ref,
        o_ref,
        x1_scratch, acc_scratch,
        *, heads, head_dim, eps, seqs_per_block, seq_len):
    """One grid step = (one batch block of `seqs_per_block` sequences,
                        one transformer layer,
                        one chunk of the FFN intermediate dimension).

    o_ref is the residual-stream carry: constant block index across the (layer, chunk)
    axes keeps it resident in VMEM; HBM writeback only happens when the batch block
    changes.  x1_scratch holds the post-attention LayerNorm output for the layer;
    acc_scratch accumulates the FFN down-projection across intermediate chunks (f32).
    """
    l = pl.program_id(1)
    c = pl.program_id(2)
    n_chunks = pl.num_programs(2)

    bt, s_len, d = seqs_per_block, seq_len, head_dim
    hdim = heads * d
    bf16 = jnp.bfloat16

    # ---------- layer entry (first FFN chunk): embeddings LN + self-attention ----------
    @pl.when(c == 0)
    def _attention():
        # Layer 0: fused embedding LayerNorm (no zero-residual HBM round trip).
        @pl.when(l == 0)
        def _():
            o_ref[...] = _layer_norm(x_ref[...], emb_g_ref[...], emb_b_ref[...], eps)

        x = o_ref[...]                                   # (Bt*S, H) f32 carry

        # Fused QKV projection: single (H, 3H) matmul, bf16 operands, f32 accumulation.
        qkv = (jnp.dot(x.astype(bf16), wqkv_ref[0],
                       preferred_element_type=jnp.float32) + bqkv_ref[0])

        scale = jnp.float32(1.0 / math.sqrt(d))

        def heads_first(t):                              # (Bt*S, H) -> (Bt*heads, S, d)
            t = t.reshape(bt, s_len, heads, d)
            t = jnp.transpose(t, (0, 2, 1, 3))           # minor dim untouched
            return t.reshape(bt * heads, s_len, d)

        # Fold 1/sqrt(d) into q (cheaper than scaling (S,S) scores).
        q = heads_first(qkv[:, :hdim] * scale).astype(bf16)
        k = heads_first(qkv[:, hdim:2 * hdim]).astype(bf16)
        v = heads_first(qkv[:, 2 * hdim:]).astype(bf16)

        # Head-batched attention: one 3-D dot_general over (Bt*heads, S, d).
        s = jnp.einsum('nqd,nkd->nqk', q, k, preferred_element_type=jnp.float32)
        # attention-mask bias: per sequence, broadcast over heads/query (no per-head copy)
        s = s.reshape(bt, heads, s_len, s_len) + bias_ref[...].reshape(bt, 1, 1, s_len)

        m = jnp.max(s, axis=-1, keepdims=True)           # f32 softmax statistics
        p = jnp.exp(s - m)
        p = p * pl.reciprocal(jnp.sum(p, axis=-1, keepdims=True), approx=True)
        p = p.reshape(bt * heads, s_len, s_len).astype(bf16)

        ctx = jnp.einsum('nqk,nkd->nqd', p, v, preferred_element_type=jnp.float32)
        ctx = jnp.transpose(ctx.reshape(bt, heads, s_len, d), (0, 2, 1, 3))
        ctx = ctx.reshape(bt * s_len, hdim)

        # Attention output projection + residual + LayerNorm (fused epilogue).
        attn = (jnp.dot(ctx.astype(bf16), wo_ref[0],
                        preferred_element_type=jnp.float32) + bo_ref[0])
        x1_scratch[...] = _layer_norm(attn + x, ln1_g_ref[0], ln1_b_ref[0], eps)
        acc_scratch[...] = jnp.zeros_like(acc_scratch)

    # -------- FFN chunk c: GELU(x1 @ Wi[:, c*ck:(c+1)*ck]) @ Wf[c*ck:(c+1)*ck, :] -------
    # Only a slice of Wi/Wf is resident per buffer; the (rows, I) intermediate never
    # materializes in full.  Down-projection accumulated in f32 VMEM scratch.
    x1 = x1_scratch[...]
    inter = _gelu(jnp.dot(x1.astype(bf16), wi_ref[0],
                          preferred_element_type=jnp.float32) + bi_ref[0])
    acc_scratch[...] += jnp.dot(inter.astype(bf16), wf_ref[0],
                                preferred_element_type=jnp.float32)

    # ---------- layer exit (last FFN chunk): bias + residual + LayerNorm into carry -----
    @pl.when(c == n_chunks - 1)
    def _():
        # attention-prob / hidden dropout: identity at inference.
        o_ref[...] = _layer_norm(acc_scratch[...] + bf_ref[0] + x1,
                                 ln2_g_ref[0], ln2_b_ref[0], eps)


def _pick_vmem_limit_bytes():
    """Per-generation VMEM budget: ~3/4 of physical, capped at 100 MiB.
    => ~48 MiB on v7x (64 MiB physical), ~96 MiB on v5e/v6e (128 MiB physical)."""
    try:
        cap = int(pltpu.get_tpu_info().vmem_capacity_bytes)
    except Exception:
        cap = 64 * 1024 * 1024
    return max(32 * 1024 * 1024, min(100 * 1024 * 1024, (cap * 3) // 4))


def bert_encoder(x_emb, bias, emb_g, emb_b, stacked, cfg, B, S):
    """x_emb: (B*S, H) f32 summed embeddings; bias: (B, 1, S) f32; stacked: per-layer
    params stacked on a leading layer axis (matmul weights already bf16).
    Returns (B*S, H) f32 sequence output."""
    assert cfg.heads * cfg.head_dim == cfg.hidden
    L, H, I = cfg.layers, cfg.hidden, cfg.intermediate
    Bt = cfg.seqs_per_block
    chunk = cfg.ffn_chunk
    assert B % Bt == 0, "batch must be divisible by seqs_per_block"
    assert I % chunk == 0 and (chunk % 128 == 0 or chunk == I)
    C = I // chunk

    kern = functools.partial(_bert_encoder_kernel, heads=cfg.heads,
                             head_dim=cfg.head_dim, eps=cfg.eps,
                             seqs_per_block=Bt, seq_len=S)

    rows = lambda b, l, c: (b, 0)            # (Bt*S, H) row block of (B*S, H)
    per_layer = lambda b, l, c: (l, 0, 0)    # stream layer l's weights (double-buffered)
    per_batch = lambda b, l, c: (b, 0, 0)
    const2 = lambda b, l, c: (0, 0)
    wi_map = lambda b, l, c: (l, 0, c)       # FFN up-proj column chunk
    bi_map = lambda b, l, c: (l, 0, c)
    wf_map = lambda b, l, c: (l, c, 0)       # FFN down-proj row chunk

    in_specs = [
        pl.BlockSpec((Bt * S, H), rows),          # summed embeddings (f32)
        pl.BlockSpec((Bt, 1, S), per_batch),      # attention bias (B,1,S) f32
        pl.BlockSpec((1, H), const2),             # embedding LN gamma
        pl.BlockSpec((1, H), const2),             # embedding LN beta
        pl.BlockSpec((1, H, 3 * H), per_layer),   # Wqkv (bf16)
        pl.BlockSpec((1, 1, 3 * H), per_layer),   # bqkv (f32)
        pl.BlockSpec((1, H, H), per_layer),       # Wo   (bf16)
        pl.BlockSpec((1, 1, H), per_layer),       # bo
        pl.BlockSpec((1, 1, H), per_layer),       # ln1 gamma
        pl.BlockSpec((1, 1, H), per_layer),       # ln1 beta
        pl.BlockSpec((1, H, chunk), wi_map),      # Wi chunk (bf16)
        pl.BlockSpec((1, 1, chunk), bi_map),      # bi chunk
        pl.BlockSpec((1, chunk, H), wf_map),      # Wf chunk (bf16)
        pl.BlockSpec((1, 1, H), per_layer),       # bf
        pl.BlockSpec((1, 1, H), per_layer),       # ln2 gamma
        pl.BlockSpec((1, 1, H), per_layer),       # ln2 beta
    ]

    return pl.pallas_call(
        kern,
        out_shape=jax.ShapeDtypeStruct((B * S, H), jnp.float32),
        grid=(B // Bt, L, C),
        in_specs=in_specs,
        out_specs=pl.BlockSpec((Bt * S, H), rows),
        scratch_shapes=[pltpu.VMEM((Bt * S, H), jnp.float32),   # x1 (post-attn LN)
                        pltpu.VMEM((Bt * S, H), jnp.float32)],  # FFN accumulator
        compiler_params=pltpu.CompilerParams(
            dimension_semantics=("parallel", "arbitrary", "arbitrary"),
            vmem_limit_bytes=_pick_vmem_limit_bytes()),
    )(x_emb, bias, emb_g, emb_b, *stacked)


# ---------------------------------- model glue ---------------------------------- #

class Config:
    vocab = 100
    max_pos = 64
    type_vocab = 2
    hidden = 128          # real BERT-base: 768
    heads = 4             # real: 12
    head_dim = 32         # real: 64
    layers = 2            # real: 12
    intermediate = 512    # real: 3072
    eps = 1e-12
    # perf knobs (review): amortize weight streaming over multiple sequences per step,
    # and tile the FFN intermediate dim (512-768 column chunks at real shapes).
    seqs_per_block = 2
    ffn_chunk = 256


def init_params(key, cfg):
    std = 0.02
    L, H, I = cfg.layers, cfg.hidden, cfg.intermediate

    def normal(k, shape):
        return jax.random.normal(k, shape, dtype=jnp.float32) * std

    keys = iter(jax.random.split(key, 16))
    return {
        'word_emb': normal(next(keys), (cfg.vocab, H)),
        'pos_emb': normal(next(keys), (cfg.max_pos, H)),
        'type_emb': normal(next(keys), (cfg.type_vocab, H)),
        'emb_ln_g': jnp.ones((1, H), jnp.float32),
        'emb_ln_b': jnp.zeros((1, H), jnp.float32),
        'l0_w': normal(next(keys), (H, 2)),
        'l0_b': jnp.zeros((2,), jnp.float32),
        # per-layer parameters stacked along a leading layer axis for the fused kernel
        'wqkv': normal(next(keys), (L, H, 3 * H)),
        'bqkv': jnp.zeros((L, 1, 3 * H), jnp.float32),
        'wo': normal(next(keys), (L, H, H)),
        'bo': jnp.zeros((L, 1, H), jnp.float32),
        'ln1_g': jnp.ones((L, 1, H), jnp.float32),
        'ln1_b': jnp.zeros((L, 1, H), jnp.float32),
        'wi': normal(next(keys), (L, H, I)),
        'bi': jnp.zeros((L, 1, I), jnp.float32),
        'wf': normal(next(keys), (L, I, H)),
        'bf': jnp.zeros((L, 1, H), jnp.float32),
        'ln2_g': jnp.ones((L, 1, H), jnp.float32),
        'ln2_b': jnp.zeros((L, 1, H), jnp.float32),
    }


def bert_base_uncased_forward(params, ids, mask, token_type_ids, cfg):
    """Mirrors BERTBaseUncased.forward -> (start_logits, end_logits)."""
    B, S = ids.shape
    H = cfg.hidden

    # Embedding gathers stay in XLA (glue); sum of word + position + segment embeddings.
    pos_ids = jnp.arange(S, dtype=jnp.int32)
    emb = (jnp.take(params['word_emb'], ids, axis=0)
           + jnp.take(params['pos_emb'], pos_ids, axis=0)[None, :, :]
           + jnp.take(params['type_emb'], token_type_ids, axis=0))
    emb = emb.reshape(B * S, H)

    # Extended attention-mask bias, once per batch element (no per-head duplication).
    bias = ((1.0 - mask.astype(jnp.float32)) * -10000.0).reshape(B, 1, S)

    # Matmul weights handed to the kernel in bf16 (halves weight HBM/VMEM, ~3x MXU);
    # biases and LayerNorm params stay f32 (added after f32 accumulation).
    bf16 = jnp.bfloat16
    stacked = [
        params['wqkv'].astype(bf16), params['bqkv'],
        params['wo'].astype(bf16), params['bo'],
        params['ln1_g'], params['ln1_b'],
        params['wi'].astype(bf16), params['bi'],
        params['wf'].astype(bf16), params['bf'],
        params['ln2_g'], params['ln2_b'],
    ]
    # TODO(synk): at real BERT shapes, pad S to a multiple of 128 (mask=0 on pad) so the
    # bias / score blocks are lane-dense; unnecessary at this toy S.
    seq_out = bert_encoder(emb, bias, params['emb_ln_g'], params['emb_ln_b'],
                           stacked, cfg, B, S)                  # (B*S, H)

    # bert_drop / pooled_output are unused by the logits path; dropout is identity at eval.
    # Final 2-wide classifier kept in plain XLA (lane-degenerate Pallas output would force
    # masked stores; per perf review).
    logits = (seq_out @ params['l0_w'] + params['l0_b']).reshape(B, S, 2)
    return logits[..., 0], logits[..., 1]


# ------------------------------ pure-JAX reference ------------------------------ #

def _reference_forward(params, ids, mask, token_type_ids, cfg):
    B, S = ids.shape
    H, nH, dH = cfg.hidden, cfg.heads, cfg.head_dim
    pos_ids = jnp.arange(S, dtype=jnp.int32)
    x = (jnp.take(params['word_emb'], ids, axis=0)
         + jnp.take(params['pos_emb'], pos_ids, axis=0)[None]
         + jnp.take(params['type_emb'], token_type_ids, axis=0))

    def ln(h, g, b):
        mu = h.mean(-1, keepdims=True)
        var = ((h - mu) ** 2).mean(-1, keepdims=True)
        return (h - mu) * jax.lax.rsqrt(var + cfg.eps) * g.reshape(1, 1, -1) + b.reshape(1, 1, -1)

    x = ln(x, params['emb_ln_g'], params['emb_ln_b'])
    bias = ((1.0 - mask.astype(jnp.float32)) * -10000.0)[:, None, None, :]
    c = math.sqrt(2.0 / math.pi)
    for l in range(cfg.layers):
        qkv = x @ params['wqkv'][l] + params['bqkv'][l]
        q, k, v = jnp.split(qkv, 3, axis=-1)
        split = lambda t: t.reshape(B, S, nH, dH).transpose(0, 2, 1, 3)
        q, k, v = split(q), split(k), split(v)
        s = jnp.einsum('bhqd,bhkd->bhqk', q, k) / math.sqrt(dH) + bias
        p = jax.nn.softmax(s, axis=-1)
        ctx = jnp.einsum('bhqk,bhkd->bhqd', p, v).transpose(0, 2, 1, 3).reshape(B, S, H)
        x1 = ln(ctx @ params['wo'][l] + params['bo'][l] + x,
                params['ln1_g'][l], params['ln1_b'][l])
        hmid = x1 @ params['wi'][l] + params['bi'][l]
        hmid = 0.5 * hmid * (1.0 + jnp.tanh(c * (hmid + 0.044715 * hmid ** 3)))
        x = ln(hmid @ params['wf'][l] + params['bf'][l] + x1,
               params['ln2_g'][l], params['ln2_b'][l])
    logits = (x.reshape(B * S, H) @ params['l0_w'] + params['l0_b']).reshape(B, S, 2)
    return logits[..., 0], logits[..., 1]


# ------------------------------------- main -------------------------------------- #

if __name__ == "__main__":
    cfg = Config()
    B, S = 4, 8   # B=4 with seqs_per_block=2 -> batch grid extent 2 (megacore-parallel)

    key = jax.random.PRNGKey(0)
    kp, ki = jax.random.split(key)
    params = init_params(kp, cfg)

    ids = jax.random.randint(ki, (B, S), 0, cfg.vocab, dtype=jnp.int32)
    mask = jnp.ones((B, S), dtype=jnp.int32)
    token_type_ids = jnp.zeros((B, S), dtype=jnp.int32)

    fwd = jax.jit(functools.partial(bert_base_uncased_forward, cfg=cfg))
    start_logits, end_logits = fwd(params, ids, mask, token_type_ids)
    jax.block_until_ready((start_logits, end_logits))

    assert start_logits.shape == (B, S) and end_logits.shape == (B, S)

    ref_start, ref_end = _reference_forward(params, ids, mask, token_type_ids, cfg)
    err = max(float(jnp.max(jnp.abs(start_logits - ref_start))),
              float(jnp.max(jnp.abs(end_logits - ref_end))))
    assert err < 5e-2, f"mismatch vs reference: {err}"

    print("KERNEL_OK")
</pallas_src>

<mosaic_0001>
module attributes {stable_mosaic.version = 11 : i64} {
  func.func @_bert_encoder_kernel(%arg0: i32, %arg1: i32, %arg2: i32, %arg3: memref<16x128xf32, #tpu.memory_space<vmem>>, %arg4: memref<2x1x8xf32, #tpu.memory_space<vmem>>, %arg5: memref<1x128xf32, #tpu.memory_space<vmem>>, %arg6: memref<1x128xf32, #tpu.memory_space<vmem>>, %arg7: memref<1x128x384xbf16, #tpu.memory_space<vmem>>, %arg8: memref<1x1x384xf32, #tpu.memory_space<vmem>>, %arg9: memref<1x128x128xbf16, #tpu.memory_space<vmem>>, %arg10: memref<1x1x128xf32, #tpu.memory_space<vmem>>, %arg11: memref<1x1x128xf32, #tpu.memory_space<vmem>>, %arg12: memref<1x1x128xf32, #tpu.memory_space<vmem>>, %arg13: memref<1x128x256xbf16, #tpu.memory_space<vmem>>, %arg14: memref<1x1x256xf32, #tpu.memory_space<vmem>>, %arg15: memref<1x256x128xbf16, #tpu.memory_space<vmem>>, %arg16: memref<1x1x128xf32, #tpu.memory_space<vmem>>, %arg17: memref<1x1x128xf32, #tpu.memory_space<vmem>>, %arg18: memref<1x1x128xf32, #tpu.memory_space<vmem>>, %arg19: memref<16x128xf32, #tpu.memory_space<vmem>>, %arg20: memref<16x128xf32, #tpu.memory_space<vmem>>, %arg21: memref<16x128xf32, #tpu.memory_space<vmem>>) attributes {dimension_semantics = [#tpu.dimension_semantics<parallel>, #tpu.dimension_semantics<arbitrary>, #tpu.dimension_semantics<arbitrary>], iteration_bounds = array<i64: 2, 2, 2>, scalar_prefetch = 0 : i64, scratch_operands = 2 : i64, tpu.core_type = #tpu.core_type<tc>, window_params = [{transform_indices = @transform_0, window_bounds = array<i64: 16, 128>}, {transform_indices = @transform_1, window_bounds = array<i64: 2, 1, 8>}, {pipeline_mode = #tpu.pipeline_mode<synchronous>, transform_indices = @transform_2, window_bounds = array<i64: 1, 128>}, {pipeline_mode = #tpu.pipeline_mode<synchronous>, transform_indices = @transform_3, window_bounds = array<i64: 1, 128>}, {transform_indices = @transform_4, window_bounds = array<i64: 1, 128, 384>}, {transform_indices = @transform_5, window_bounds = array<i64: 1, 1, 384>}, {transform_indices = @transform_6, window_bounds = array<i64: 1, 128, 128>}, {transform_indices = @transform_7, window_bounds = array<i64: 1, 1, 128>}, {transform_indices = @transform_8, window_bounds = array<i64: 1, 1, 128>}, {transform_indices = @transform_9, window_bounds = array<i64: 1, 1, 128>}, {transform_indices = @transform_10, window_bounds = array<i64: 1, 128, 256>}, {transform_indices = @transform_11, window_bounds = array<i64: 1, 1, 256>}, {transform_indices = @transform_12, window_bounds = array<i64: 1, 256, 128>}, {transform_indices = @transform_13, window_bounds = array<i64: 1, 1, 128>}, {transform_indices = @transform_14, window_bounds = array<i64: 1, 1, 128>}, {transform_indices = @transform_15, window_bounds = array<i64: 1, 1, 128>}, {transform_indices = @transform_16, window_bounds = array<i64: 16, 128>}]} {
    %c0_i32 = arith.constant 0 : i32
    %0 = arith.cmpi eq, %arg2, %c0_i32 : i32
    %1 = arith.extui %0 : i1 to i32
    %c0_i32_0 = arith.constant 0 : i32
    %2 = arith.cmpi ne, %1, %c0_i32_0 : i32
    scf.if %2 {
      %c0_i32_21 = arith.constant 0 : i32
      %35 = arith.cmpi eq, %arg1, %c0_i32_21 : i32
      %36 = arith.extui %35 : i1 to i32
      %c0_i32_22 = arith.constant 0 : i32
      %37 = arith.cmpi ne, %36, %c0_i32_22 : i32
      scf.if %37 {
        %c0_63 = arith.constant 0 : index
        %c0_64 = arith.constant 0 : index
        %124 = vector.load %arg3[%c0_63, %c0_64] : memref<16x128xf32, #tpu.memory_space<vmem>>, vector<16x128xf32>
        %c0_65 = arith.constant 0 : index
        %c0_66 = arith.constant 0 : index
        %125 = vector.load %arg5[%c0_65, %c0_66] : memref<1x128xf32, #tpu.memory_space<vmem>>, vector<1x128xf32>
        %c0_67 = arith.constant 0 : index
        %c0_68 = arith.constant 0 : index
        %126 = vector.load %arg6[%c0_67, %c0_68] : memref<1x128xf32, #tpu.memory_space<vmem>>, vector<1x128xf32>
        %cst_69 = arith.constant dense<0.000000e+00> : vector<16xf32>
        %127 = vector.multi_reduction <add>, %124, %cst_69 [1] : vector<16x128xf32> to vector<16xf32>
        %128 = vector.shape_cast %127 : vector<16xf32> to vector<16x1xf32>
        %cst_70 = arith.constant 1.280000e+02 : f32
        %129 = vector.broadcast %cst_70 : f32 to vector<16x1xf32>
        %130 = arith.divf %128, %129 : vector<16x1xf32>
        %131 = vector.broadcast %130 : vector<16x1xf32> to vector<16x128xf32>
        %132 = arith.subf %124, %131 : vector<16x128xf32>
        %133 = arith.mulf %132, %132 : vector<16x128xf32>
        %cst_71 = arith.constant dense<0.000000e+00> : vector<16xf32>
        %134 = vector.multi_reduction <add>, %133, %cst_71 [1] : vector<16x128xf32> to vector<16xf32>
        %135 = vector.shape_cast %134 : vector<16xf32> to vector<16x1xf32>
        %cst_72 = arith.constant 1.280000e+02 : f32
        %136 = vector.broadcast %cst_72 : f32 to vector<16x1xf32>
        %137 = arith.divf %135, %136 : vector<16x1xf32>
        %138 = vector.broadcast %130 : vector<16x1xf32> to vector<16x128xf32>
        %139 = arith.subf %124, %138 : vector<16x128xf32>
        %cst_73 = arith.constant 9.99999996E-13 : f32
        %140 = vector.broadcast %cst_73 : f32 to vector<16x1xf32>
        %141 = arith.addf %137, %140 : vector<16x1xf32>
        %142 = math.rsqrt %141 : vector<16x1xf32>
        %143 = vector.broadcast %142 : vector<16x1xf32> to vector<16x128xf32>
        %144 = arith.mulf %139, %143 : vector<16x128xf32>
        %145 = vector.broadcast %125 : vector<1x128xf32> to vector<16x128xf32>
        %146 = arith.mulf %144, %145 : vector<16x128xf32>
        %147 = vector.broadcast %126 : vector<1x128xf32> to vector<16x128xf32>
        %148 = arith.addf %146, %147 : vector<16x128xf32>
        %c0_74 = arith.constant 0 : index
        %c0_75 = arith.constant 0 : index
        %149 = vector.load %arg19[%c0_74, %c0_75] : memref<16x128xf32, #tpu.memory_space<vmem>>, vector<16x128xf32>
        tpu.vector_store %arg19[%c0_74, %c0_75], %148 {strides = array<i32>} : memref<16x128xf32, #tpu.memory_space<vmem>>, vector<16x128xf32>,
      } else {
      }
      %c0_23 = arith.constant 0 : index
      %c0_24 = arith.constant 0 : index
      %38 = vector.load %arg19[%c0_23, %c0_24] : memref<16x128xf32, #tpu.memory_space<vmem>>, vector<16x128xf32>
      %39 = arith.truncf %38 : vector<16x128xf32> to vector<16x128xbf16>
      %c0_25 = arith.constant 0 : index
      %c0_26 = arith.constant 0 : index
      %c0_27 = arith.constant 0 : index
      %40 = vector.load %arg7[%c0_25, %c0_26, %c0_27] : memref<1x128x384xbf16, #tpu.memory_space<vmem>>, vector<1x128x384xbf16>
      %41 = vector.shape_cast %40 : vector<1x128x384xbf16> to vector<128x384xbf16>
      %cst_28 = arith.constant dense<0.000000e+00> : vector<16x384xf32>
      %42 = tpu.matmul %39, %41, %cst_28 {dimension_numbers = #tpu.dot_dimension_numbers<[1], [0], [0], [1], [0, 0, 1, 1], [], []>} : vector<16x128xbf16>, vector<128x384xbf16>, vector<16x384xf32> -> vector<16x384xf32>
      %c0_29 = arith.constant 0 : index
      %c0_30 = arith.constant 0 : index
      %c0_31 = arith.constant 0 : index
      %43 = vector.load %arg8[%c0_29, %c0_30, %c0_31] : memref<1x1x384xf32, #tpu.memory_space<vmem>>, vector<1x1x384xf32>
      %44 = vector.shape_cast %43 : vector<1x1x384xf32> to vector<1x384xf32>
      %45 = vector.broadcast %44 : vector<1x384xf32> to vector<16x384xf32>
      %46 = arith.addf %42, %45 : vector<16x384xf32>
      %47 = vector.extract_strided_slice %46 {offsets = [0, 0], sizes = [16, 128], strides = [1, 1]} : vector<16x384xf32> to vector<16x128xf32>
      %cst_32 = arith.constant 0.176776692 : f32
      %48 = vector.broadcast %cst_32 : f32 to vector<16x128xf32>
      %49 = arith.mulf %47, %48 : vector<16x128xf32>
      %50 = vector.shape_cast %49 : vector<16x128xf32> to vector<2x8x4x32xf32>
      %51 = tpu.transpose %50, [0, 2, 1, 3] : vector<2x8x4x32xf32> -> vector<2x4x8x32xf32>
      %52 = vector.shape_cast %51 : vector<2x4x8x32xf32> to vector<8x8x32xf32>
      %53 = arith.truncf %52 : vector<8x8x32xf32> to vector<8x8x32xbf16>
      %54 = vector.extract_strided_slice %46 {offsets = [0, 128], sizes = [16, 128], strides = [1, 1]} : vector<16x384xf32> to vector<16x128xf32>
      %55 = vector.shape_cast %54 : vector<16x128xf32> to vector<2x8x4x32xf32>
      %56 = tpu.transpose %55, [0, 2, 1, 3] : vector<2x8x4x32xf32> -> vector<2x4x8x32xf32>
      %57 = vector.shape_cast %56 : vector<2x4x8x32xf32> to vector<8x8x32xf32>
      %58 = arith.truncf %57 : vector<8x8x32xf32> to vector<8x8x32xbf16>
      %59 = vector.extract_strided_slice %46 {offsets = [0, 256], sizes = [16, 128], strides = [1, 1]} : vector<16x384xf32> to vector<16x128xf32>
      %60 = vector.shape_cast %59 : vector<16x128xf32> to vector<2x8x4x32xf32>
      %61 = tpu.transpose %60, [0, 2, 1, 3] : vector<2x8x4x32xf32> -> vector<2x4x8x32xf32>
      %62 = vector.shape_cast %61 : vector<2x4x8x32xf32> to vector<8x8x32xf32>
      %63 = arith.truncf %62 : vector<8x8x32xf32> to vector<8x8x32xbf16>
      "tpu.trace_start"() <{level = 10 : i32, message = "nqd,nkd->nqk"}> : () -> ()
      %cst_33 = arith.constant dense<0.000000e+00> : vector<8x8x8xf32>
      %64 = tpu.matmul %53, %58, %cst_33 {dimension_numbers = #tpu.dot_dimension_numbers<[2], [2], [1], [1], [0, 0, 0, 1, 1, 1], [0], [0]>} : vector<8x8x32xbf16>, vector<8x8x32xbf16>, vector<8x8x8xf32> -> vector<8x8x8xf32>
      "tpu.trace_stop"() : () -> ()
      %65 = vector.shape_cast %64 : vector<8x8x8xf32> to vector<2x4x8x8xf32>
      %c0_34 = arith.constant 0 : index
      %c0_35 = arith.constant 0 : index
      %c0_36 = arith.constant 0 : index
      %66 = vector.load %arg4[%c0_34, %c0_35, %c0_36] : memref<2x1x8xf32, #tpu.memory_space<vmem>>, vector<2x1x8xf32>
      %67 = vector.shape_cast %66 : vector<2x1x8xf32> to vector<2x1x1x8xf32>
      %68 = vector.broadcast %67 : vector<2x1x1x8xf32> to vector<2x4x8x8xf32>
      %69 = arith.addf %65, %68 : vector<2x4x8x8xf32>
      %cst_37 = arith.constant dense<0xFF800000> : vector<2x4x8xf32>
      %70 = vector.multi_reduction <maximumf>, %69, %cst_37 [3] : vector<2x4x8x8xf32> to vector<2x4x8xf32>
      %71 = vector.shape_cast %70 : vector<2x4x8xf32> to vector<2x4x8x1xf32>
      %72 = vector.broadcast %71 : vector<2x4x8x1xf32> to vector<2x4x8x8xf32>
      %73 = arith.subf %69, %72 : vector<2x4x8x8xf32>
      %74 = math.exp %73 : vector<2x4x8x8xf32>
      %cst_38 = arith.constant dense<0.000000e+00> : vector<2x4x8xf32>
      %75 = vector.multi_reduction <add>, %74, %cst_38 [3] : vector<2x4x8x8xf32> to vector<2x4x8xf32>
      %76 = vector.shape_cast %75 : vector<2x4x8xf32> to vector<2x4x8x1xf32>
      %77 = tpu.reciprocal %76 {approx = true} : vector<2x4x8x1xf32> -> vector<2x4x8x1xf32>
      %78 = vector.broadcast %77 : vector<2x4x8x1xf32> to vector<2x4x8x8xf32>
      %79 = arith.mulf %74, %78 : vector<2x4x8x8xf32>
      %80 = vector.shape_cast %79 : vector<2x4x8x8xf32> to vector<8x8x8xf32>
      %81 = arith.truncf %80 : vector<8x8x8xf32> to vector<8x8x8xbf16>
      "tpu.trace_start"() <{level = 10 : i32, message = "nqk,nkd->nqd"}> : () -> ()
      %cst_39 = arith.constant dense<0.000000e+00> : vector<8x8x32xf32>
      %82 = tpu.matmul %81, %63, %cst_39 {dimension_numbers = #tpu.dot_dimension_numbers<[2], [1], [1], [2], [0, 0, 0, 1, 1, 2], [0], [0]>} : vector<8x8x8xbf16>, vector<8x8x32xbf16>, vector<8x8x32xf32> -> vector<8x8x32xf32>
      "tpu.trace_stop"() : () -> ()
      %83 = vector.shape_cast %82 : vector<8x8x32xf32> to vector<2x4x8x32xf32>
      %84 = tpu.transpose %83, [0, 2, 1, 3] : vector<2x4x8x32xf32> -> vector<2x8x4x32xf32>
      %85 = vector.shape_cast %84 : vector<2x8x4x32xf32> to vector<16x128xf32>
      %86 = arith.truncf %85 : vector<16x128xf32> to vector<16x128xbf16>
      %c0_40 = arith.constant 0 : index
      %c0_41 = arith.constant 0 : index
      %c0_42 = arith.constant 0 : index
      %87 = vector.load %arg9[%c0_40, %c0_41, %c0_42] : memref<1x128x128xbf16, #tpu.memory_space<vmem>>, vector<1x128x128xbf16>
      %88 = vector.shape_cast %87 : vector<1x128x128xbf16> to vector<128x128xbf16>
      %cst_43 = arith.constant dense<0.000000e+00> : vector<16x128xf32>
      %89 = tpu.matmul %86, %88, %cst_43 {dimension_numbers = #tpu.dot_dimension_numbers<[1], [0], [0], [1], [0, 0, 1, 1], [], []>} : vector<16x128xbf16>, vector<128x128xbf16>, vector<16x128xf32> -> vector<16x128xf32>
      %c0_44 = arith.constant 0 : index
      %c0_45 = arith.constant 0 : index
      %c0_46 = arith.constant 0 : index
      %90 = vector.load %arg10[%c0_44, %c0_45, %c0_46] : memref<1x1x128xf32, #tpu.memory_space<vmem>>, vector<1x1x128xf32>
      %91 = vector.shape_cast %90 : vector<1x1x128xf32> to vector<1x128xf32>
      %92 = vector.broadcast %91 : vector<1x128xf32> to vector<16x128xf32>
      %93 = arith.addf %89, %92 : vector<16x128xf32>
      %94 = arith.addf %93, %38 : vector<16x128xf32>
      %c0_47 = arith.constant 0 : index
      %c0_48 = arith.constant 0 : index
      %c0_49 = arith.constant 0 : index
      %95 = vector.load %arg11[%c0_47, %c0_48, %c0_49] : memref<1x1x128xf32, #tpu.memory_space<vmem>>, vector<1x1x128xf32>
      %96 = vector.shape_cast %95 : vector<1x1x128xf32> to vector<1x128xf32>
      %c0_50 = arith.constant 0 : index
      %c0_51 = arith.constant 0 : index
      %c0_52 = arith.constant 0 : index
      %97 = vector.load %arg12[%c0_50, %c0_51, %c0_52] : memref<1x1x128xf32, #tpu.memory_space<vmem>>, vector<1x1x128xf32>
      %98 = vector.shape_cast %97 : vector<1x1x128xf32> to vector<1x128xf32>
      %cst_53 = arith.constant dense<0.000000e+00> : vector<16xf32>
      %99 = vector.multi_reduction <add>, %94, %cst_53 [1] : vector<16x128xf32> to vector<16xf32>
      %100 = vector.shape_cast %99 : vector<16xf32> to vector<16x1xf32>
      %cst_54 = arith.constant 1.280000e+02 : f32
      %101 = vector.broadcast %cst_54 : f32 to vector<16x1xf32>
      %102 = arith.divf %100, %101 : vector<16x1xf32>
      %103 = vector.broadcast %102 : vector<16x1xf32> to vector<16x128xf32>
      %104 = arith.subf %94, %103 : vector<16x128xf32>
      %105 = arith.mulf %104, %104 : vector<16x128xf32>
      %cst_55 = arith.constant dense<0.000000e+00> : vector<16xf32>
      %106 = vector.multi_reduction <add>, %105, %cst_55 [1] : vector<16x128xf32> to vector<16xf32>
      %107 = vector.shape_cast %106 : vector<16xf32> to vector<16x1xf32>
      %cst_56 = arith.constant 1.280000e+02 : f32
      %108 = vector.broadcast %cst_56 : f32 to vector<16x1xf32>
      %109 = arith.divf %107, %108 : vector<16x1xf32>
      %110 = vector.broadcast %102 : vector<16x1xf32> to vector<16x128xf32>
      %111 = arith.subf %94, %110 : vector<16x128xf32>
      %cst_57 = arith.constant 9.99999996E-13 : f32
      %112 = vector.broadcast %cst_57 : f32 to vector<16x1xf32>
      %113 = arith.addf %109, %112 : vector<16x1xf32>
      %114 = math.rsqrt %113 : vector<16x1xf32>
      %115 = vector.broadcast %114 : vector<16x1xf32> to vector<16x128xf32>
      %116 = arith.mulf %111, %115 : vector<16x128xf32>
      %117 = vector.broadcast %96 : vector<1x128xf32> to vector<16x128xf32>
      %118 = arith.mulf %116, %117 : vector<16x128xf32>
      %119 = vector.broadcast %98 : vector<1x128xf32> to vector<16x128xf32>
      %120 = arith.addf %118, %119 : vector<16x128xf32>
      %c0_58 = arith.constant 0 : index
      %c0_59 = arith.constant 0 : index
      %121 = vector.load %arg20[%c0_58, %c0_59] : memref<16x128xf32, #tpu.memory_space<vmem>>, vector<16x128xf32>
      tpu.vector_store %arg20[%c0_58, %c0_59], %120 {strides = array<i32>} : memref<16x128xf32, #tpu.memory_space<vmem>>, vector<16x128xf32>,
      %cst_60 = arith.constant 0.000000e+00 : f32
      %122 = vector.broadcast %cst_60 : f32 to vector<16x128xf32>
      %c0_61 = arith.constant 0 : index
      %c0_62 = arith.constant 0 : index
      %123 = vector.load %arg21[%c0_61, %c0_62] : memref<16x128xf32, #tpu.memory_space<vmem>>, vector<16x128xf32>
      tpu.vector_store %arg21[%c0_61, %c0_62], %122 {strides = array<i32>} : memref<16x128xf32, #tpu.memory_space<vmem>>, vector<16x128xf32>,
    } else {
    }
    %c0 = arith.constant 0 : index
    %c0_1 = arith.constant 0 : index
    %3 = vector.load %arg20[%c0, %c0_1] : memref<16x128xf32, #tpu.memory_space<vmem>>, vector<16x128xf32>
    %4 = arith.truncf %3 : vector<16x128xf32> to vector<16x128xbf16>
    %c0_2 = arith.constant 0 : index
    %c0_3 = arith.constant 0 : index
    %c0_4 = arith.constant 0 : index
    %5 = vector.load %arg13[%c0_2, %c0_3, %c0_4] : memref<1x128x256xbf16, #tpu.memory_space<vmem>>, vector<1x128x256xbf16>
    %6 = vector.shape_cast %5 : vector<1x128x256xbf16> to vector<128x256xbf16>
    %cst = arith.constant dense<0.000000e+00> : vector<16x256xf32>
    %7 = tpu.matmul %4, %6, %cst {dimension_numbers = #tpu.dot_dimension_numbers<[1], [0], [0], [1], [0, 0, 1, 1], [], []>} : vector<16x128xbf16>, vector<128x256xbf16>, vector<16x256xf32> -> vector<16x256xf32>
    %c0_5 = arith.constant 0 : index
    %c0_6 = arith.constant 0 : index
    %c0_7 = arith.constant 0 : index
    %8 = vector.load %arg14[%c0_5, %c0_6, %c0_7] : memref<1x1x256xf32, #tpu.memory_space<vmem>>, vector<1x1x256xf32>
    %9 = vector.shape_cast %8 : vector<1x1x256xf32> to vector<1x256xf32>
    %10 = vector.broadcast %9 : vector<1x256xf32> to vector<16x256xf32>
    %11 = arith.addf %7, %10 : vector<16x256xf32>
    %cst_8 = arith.constant 5.000000e-01 : f32
    %12 = vector.broadcast %cst_8 : f32 to vector<16x256xf32>
    %13 = arith.mulf %12, %11 : vector<16x256xf32>
    %cst_9 = arith.constant 4.471500e-02 : f32
    %14 = vector.broadcast %cst_9 : f32 to vector<16x256xf32>
    %15 = arith.mulf %14, %11 : vector<16x256xf32>
    %16 = arith.mulf %15, %11 : vector<16x256xf32>
    %17 = arith.mulf %16, %11 : vector<16x256xf32>
    %18 = arith.addf %11, %17 : vector<16x256xf32>
    %cst_10 = arith.constant 0.797884583 : f32
    %19 = vector.broadcast %cst_10 : f32 to vector<16x256xf32>
    %20 = arith.mulf %19, %18 : vector<16x256xf32>
    %21 = math.tanh %20 : vector<16x256xf32>
    %cst_11 = arith.constant 1.000000e+00 : f32
    %22 = vector.broadcast %cst_11 : f32 to vector<16x256xf32>
    %23 = arith.addf %22, %21 : vector<16x256xf32>
    %24 = arith.mulf %13, %23 : vector<16x256xf32>
    %c0_12 = arith.constant 0 : index
    %c0_13 = arith.constant 0 : index
    %25 = vector.load %arg21[%c0_12, %c0_13] : memref<16x128xf32, #tpu.memory_space<vmem>>, vector<16x128xf32>
    %26 = arith.truncf %24 : vector<16x256xf32> to vector<16x256xbf16>
    %c0_14 = arith.constant 0 : index
    %c0_15 = arith.constant 0 : index
    %c0_16 = arith.constant 0 : index
    %27 = vector.load %arg15[%c0_14, %c0_15, %c0_16] : memref<1x256x128xbf16, #tpu.memory_space<vmem>>, vector<1x256x128xbf16>
    %28 = vector.shape_cast %27 : vector<1x256x128xbf16> to vector<256x128xbf16>
    %cst_17 = arith.constant dense<0.000000e+00> : vector<16x128xf32>
    %29 = tpu.matmul %26, %28, %cst_17 {dimension_numbers = #tpu.dot_dimension_numbers<[1], [0], [0], [1], [0, 0, 1, 1], [], []>} : vector<16x256xbf16>, vector<256x128xbf16>, vector<16x128xf32> -> vector<16x128xf32>
    %30 = arith.addf %25, %29 : vector<16x128xf32>
    %c0_18 = arith.constant 0 : index
    %c0_19 = arith.constant 0 : index
    %31 = vector.load %arg21[%c0_18, %c0_19] : memref<16x128xf32, #tpu.memory_space<vmem>>, vector<16x128xf32>
    tpu.vector_store %arg21[%c0_18, %c0_19], %30 {strides = array<i32>} : memref<16x128xf32, #tpu.memory_space<vmem>>, vector<16x128xf32>,
    %c1_i32 = arith.constant 1 : i32
    %32 = arith.cmpi eq, %arg2, %c1_i32 : i32
    %33 = arith.extui %32 : i1 to i32
    %c0_i32_20 = arith.constant 0 : i32
    %34 = arith.cmpi ne, %33, %c0_i32_20 : i32
    scf.if %34 {
      %c0_21 = arith.constant 0 : index
      %c0_22 = arith.constant 0 : index
      %35 = vector.load %arg21[%c0_21, %c0_22] : memref<16x128xf32, #tpu.memory_space<vmem>>, vector<16x128xf32>
      %c0_23 = arith.constant 0 : index
      %c0_24 = arith.constant 0 : index
      %c0_25 = arith.constant 0 : index
      %36 = vector.load %arg16[%c0_23, %c0_24, %c0_25] : memref<1x1x128xf32, #tpu.memory_space<vmem>>, vector<1x1x128xf32>
      %37 = vector.shape_cast %36 : vector<1x1x128xf32> to vector<1x128xf32>
      %38 = vector.broadcast %37 : vector<1x128xf32> to vector<16x128xf32>
      %39 = arith.addf %35, %38 : vector<16x128xf32>
      %40 = arith.addf %39, %3 : vector<16x128xf32>
      %c0_26 = arith.constant 0 : index
      %c0_27 = arith.constant 0 : index
      %c0_28 = arith.constant 0 : index
      %41 = vector.load %arg17[%c0_26, %c0_27, %c0_28] : memref<1x1x128xf32, #tpu.memory_space<vmem>>, vector<1x1x128xf32>
      %42 = vector.shape_cast %41 : vector<1x1x128xf32> to vector<1x128xf32>
      %c0_29 = arith.constant 0 : index
      %c0_30 = arith.constant 0 : index
      %c0_31 = arith.constant 0 : index
      %43 = vector.load %arg18[%c0_29, %c0_30, %c0_31] : memref<1x1x128xf32, #tpu.memory_space<vmem>>, vector<1x1x128xf32>
      %44 = vector.shape_cast %43 : vector<1x1x128xf32> to vector<1x128xf32>
      %cst_32 = arith.constant dense<0.000000e+00> : vector<16xf32>
      %45 = vector.multi_reduction <add>, %40, %cst_32 [1] : vector<16x128xf32> to vector<16xf32>
      %46 = vector.shape_cast %45 : vector<16xf32> to vector<16x1xf32>
      %cst_33 = arith.constant 1.280000e+02 : f32
      %47 = vector.broadcast %cst_33 : f32 to vector<16x1xf32>
      %48 = arith.divf %46, %47 : vector<16x1xf32>
      %49 = vector.broadcast %48 : vector<16x1xf32> to vector<16x128xf32>
      %50 = arith.subf %40, %49 : vector<16x128xf32>
      %51 = arith.mulf %50, %50 : vector<16x128xf32>
      %cst_34 = arith.constant dense<0.000000e+00> : vector<16xf32>
      %52 = vector.multi_reduction <add>, %51, %cst_34 [1] : vector<16x128xf32> to vector<16xf32>
      %53 = vector.shape_cast %52 : vector<16xf32> to vector<16x1xf32>
      %cst_35 = arith.constant 1.280000e+02 : f32
      %54 = vector.broadcast %cst_35 : f32 to vector<16x1xf32>
      %55 = arith.divf %53, %54 : vector<16x1xf32>
      %56 = vector.broadcast %48 : vector<16x1xf32> to vector<16x128xf32>
      %57 = arith.subf %40, %56 : vector<16x128xf32>
      %cst_36 = arith.constant 9.99999996E-13 : f32
      %58 = vector.broadcast %cst_36 : f32 to vector<16x1xf32>
      %59 = arith.addf %55, %58 : vector<16x1xf32>
      %60 = math.rsqrt %59 : vector<16x1xf32>
      %61 = vector.broadcast %60 : vector<16x1xf32> to vector<16x128xf32>
      %62 = arith.mulf %57, %61 : vector<16x128xf32>
      %63 = vector.broadcast %42 : vector<1x128xf32> to vector<16x128xf32>
      %64 = arith.mulf %62, %63 : vector<16x128xf32>
      %65 = vector.broadcast %44 : vector<1x128xf32> to vector<16x128xf32>
      %66 = arith.addf %64, %65 : vector<16x128xf32>
      %c0_37 = arith.constant 0 : index
      %c0_38 = arith.constant 0 : index
      %67 = vector.load %arg19[%c0_37, %c0_38] : memref<16x128xf32, #tpu.memory_space<vmem>>, vector<16x128xf32>
      tpu.vector_store %arg19[%c0_37, %c0_38], %66 {strides = array<i32>} : memref<16x128xf32, #tpu.memory_space<vmem>>, vector<16x128xf32>,
    } else {
    }
    return
  }
  func.func @transform_0(%arg0: i32, %arg1: i32, %arg2: i32) -> (i32, i32) {
    %c0_i32 = arith.constant 0 : i32
    %c0_i32_0 = arith.constant 0 : i32
    return %arg0, %c0_i32 : i32, i32
  }
  func.func @transform_1(%arg0: i32, %arg1: i32, %arg2: i32) -> (i32, i32, i32) {
    %c0_i32 = arith.constant 0 : i32
    %c0_i32_0 = arith.constant 0 : i32
    %c0_i32_1 = arith.constant 0 : i32
    return %arg0, %c0_i32, %c0_i32_0 : i32, i32, i32
  }
  func.func @transform_2(%arg0: i32, %arg1: i32, %arg2: i32) -> (i32, i32) {
    %c0_i32 = arith.constant 0 : i32
    %c0_i32_0 = arith.constant 0 : i32
    %c0_i32_1 = arith.constant 0 : i32
    return %c0_i32, %c0_i32_0 : i32, i32
  }
  func.func @transform_3(%arg0: i32, %arg1: i32, %arg2: i32) -> (i32, i32) {
    %c0_i32 = arith.constant 0 : i32
    %c0_i32_0 = arith.constant 0 : i32
    %c0_i32_1 = arith.constant 0 : i32
    return %c0_i32, %c0_i32_0 : i32, i32
  }
  func.func @transform_4(%arg0: i32, %arg1: i32, %arg2: i32) -> (i32, i32, i32) {
    %c0_i32 = arith.constant 0 : i32
    %c0_i32_0 = arith.constant 0 : i32
    %c0_i32_1 = arith.constant 0 : i32
    return %arg1, %c0_i32, %c0_i32_0 : i32, i32, i32
  }
  func.func @transform_5(%arg0: i32, %arg1: i32, %arg2: i32) -> (i32, i32, i32) {
    %c0_i32 = arith.constant 0 : i32
    %c0_i32_0 = arith.constant 0 : i32
    %c0_i32_1 = arith.constant 0 : i32
    return %arg1, %c0_i32, %c0_i32_0 : i32, i32, i32
  }
  func.func @transform_6(%arg0: i32, %arg1: i32, %arg2: i32) -> (i32, i32, i32) {
    %c0_i32 = arith.constant 0 : i32
    %c0_i32_0 = arith.constant 0 : i32
    %c0_i32_1 = arith.constant 0 : i32
    return %arg1, %c0_i32, %c0_i32_0 : i32, i32, i32
  }
  func.func @transform_7(%arg0: i32, %arg1: i32, %arg2: i32) -> (i32, i32, i32) {
    %c0_i32 = arith.constant 0 : i32
    %c0_i32_0 = arith.constant 0 : i32
    %c0_i32_1 = arith.constant 0 : i32
    return %arg1, %c0_i32, %c0_i32_0 : i32, i32, i32
  }
  func.func @transform_8(%arg0: i32, %arg1: i32, %arg2: i32) -> (i32, i32, i32) {
    %c0_i32 = arith.constant 0 : i32
    %c0_i32_0 = arith.constant 0 : i32
    %c0_i32_1 = arith.constant 0 : i32
    return %arg1, %c0_i32, %c0_i32_0 : i32, i32, i32
  }
  func.func @transform_9(%arg0: i32, %arg1: i32, %arg2: i32) -> (i32, i32, i32) {
    %c0_i32 = arith.constant 0 : i32
    %c0_i32_0 = arith.constant 0 : i32
    %c0_i32_1 = arith.constant 0 : i32
    return %arg1, %c0_i32, %c0_i32_0 : i32, i32, i32
  }
  func.func @transform_10(%arg0: i32, %arg1: i32, %arg2: i32) -> (i32, i32, i32) {
    %c0_i32 = arith.constant 0 : i32
    %c0_i32_0 = arith.constant 0 : i32
    return %arg1, %c0_i32, %arg2 : i32, i32, i32
  }
  func.func @transform_11(%arg0: i32, %arg1: i32, %arg2: i32) -> (i32, i32, i32) {
    %c0_i32 = arith.constant 0 : i32
    %c0_i32_0 = arith.constant 0 : i32
    return %arg1, %c0_i32, %arg2 : i32, i32, i32
  }
  func.func @transform_12(%arg0: i32, %arg1: i32, %arg2: i32) -> (i32, i32, i32) {
    %c0_i32 = arith.constant 0 : i32
    %c0_i32_0 = arith.constant 0 : i32
    return %arg1, %arg2, %c0_i32 : i32, i32, i32
  }
  func.func @transform_13(%arg0: i32, %arg1: i32, %arg2: i32) -> (i32, i32, i32) {
    %c0_i32 = arith.constant 0 : i32
    %c0_i32_0 = arith.constant 0 : i32
    %c0_i32_1 = arith.constant 0 : i32
    return %arg1, %c0_i32, %c0_i32_0 : i32, i32, i32
  }
  func.func @transform_14(%arg0: i32, %arg1: i32, %arg2: i32) -> (i32, i32, i32) {
    %c0_i32 = arith.constant 0 : i32
    %c0_i32_0 = arith.constant 0 : i32
    %c0_i32_1 = arith.constant 0 : i32
    return %arg1, %c0_i32, %c0_i32_0 : i32, i32, i32
  }
  func.func @transform_15(%arg0: i32, %arg1: i32, %arg2: i32) -> (i32, i32, i32) {
    %c0_i32 = arith.constant 0 : i32
    %c0_i32_0 = arith.constant 0 : i32
    %c0_i32_1 = arith.constant 0 : i32
    return %arg1, %c0_i32, %c0_i32_0 : i32, i32, i32
  }
  func.func @transform_16(%arg0: i32, %arg1: i32, %arg2: i32) -> (i32, i32) {
    %c0_i32 = arith.constant 0 : i32
    %c0_i32_0 = arith.constant 0 : i32
    return %arg0, %c0_i32 : i32, i32
  }
}

</mosaic_0001>

<bundles_post_ra>
// kernel: bert_base_uncased_forward.1
= control target key start
LH: loop header
LB: loop body
LE: loop exit
PB: predicated region body
PF: predicated region fallthrough
CT: control target
= control target key end

     0   :  { %s5590_s0 = inlined_call_operand.vmem [shape: f32[32,128], index: 0, kind: input, shape index: {}]   ;;  %s5591_s1 = inlined_call_operand.vmem [shape: f32[4,1,8], index: 1, kind: input, shape index: {}]   ;;  %s5592_s2 = inlined_call_operand.vmem [shape: f32[1,128], index: 2, kind: input, shape index: {}]   ;;  %s5593_s3 = inlined_call_operand.vmem [shape: f32[1,128], index: 3, kind: input, shape index: {}]   ;;  %s5594_s4 = inlined_call_operand.vmem [shape: bf16[2,128,384], index: 4, kind: input, shape index: {}]   ;;  %s5595_s5 = inlined_call_operand.vmem [shape: f32[2,1,384], index: 5, kind: input, shape index: {}]   ;;  %s5596_s6 = inlined_call_operand.vmem [shape: bf16[2,128,128], index: 6, kind: input, shape index: {}]   ;;  %s5597_s7 = inlined_call_operand.vmem [shape: f32[2,1,128], index: 7, kind: input, shape index: {}]   ;;  %s5598_s8 = inlined_call_operand.vmem [shape: f32[2,1,128], index: 8, kind: input, shape index: {}]   ;;  %s5599_s9 = inlined_call_operand.vmem [shape: f32[2,1,128], index: 9, kind: input, shape index: {}]   ;;  %s5600_s10 = inlined_call_operand.vmem [shape: bf16[2,128,512], index: 10, kind: input, shape index: {}]   ;;  %s5601_s11 = inlined_call_operand.vmem [shape: f32[2,1,512], index: 11, kind: input, shape index: {}]   ;;  %s5602_s12 = inlined_call_operand.vmem [shape: bf16[2,512,128], index: 12, kind: input, shape index: {}]   ;;  %s5603_s13 = inlined_call_operand.vmem [shape: f32[2,1,128], index: 13, kind: input, shape index: {}]   ;;  %s5604_s14 = inlined_call_operand.vmem [shape: f32[2,1,128], index: 14, kind: input, shape index: {}]   ;;  %s5605_s15 = inlined_call_operand.vmem [shape: f32[2,1,128], index: 15, kind: input, shape index: {}]   ;;  %s5606_s16 = inlined_call_operand.vmem [shape: f32[32,128], index: 16, kind: output, shape index: {}]  }
   0x1   :  { %5616 = sst [smem:[#allocation16_spill]] %s5590_s0 }
   0x2   :  { %5617 = sst [smem:[#allocation17_spill]] %s5591_s1 }
   0x3   :  { %5618 = sst [smem:[#allocation18_spill]] %s5592_s2 }
   0x4   :  { %5619 = sst [smem:[#allocation19_spill]] %s5593_s3 }
   0x5   :  { %5620 = sst [smem:[#allocation20_spill]] %s5594_s4 }
   0x6   :  { %5621 = sst [smem:[#allocation21_spill]] %s5595_s5 }
   0x7   :  { %5622 = sst [smem:[#allocation22_spill]] %s5596_s6 }
   0x8   :  { %5623 = sst [smem:[#allocation23_spill]] %s5597_s7 }
   0x9   :  { %5624 = sst [smem:[#allocation24_spill]] %s5598_s8 }
   0xa   :  { %5625 = sst [smem:[#allocation25_spill]] %s5599_s9 }
   0xb   :  { %5626 = sst [smem:[#allocation26_spill]] %s5600_s10 }
   0xc   :  { %5627 = sst [smem:[#allocation27_spill]] %s5601_s11 }
   0xd   :  { %5628 = sst [smem:[#allocation28_spill]] %s5602_s12 }
   0xe   :  { %5629 = sst [smem:[#allocation29_spill]] %s5603_s13 }
   0xf   :  { %5630 = sst [smem:[#allocation30_spill]] %s5605_s15 }
  0x10   :  { %5631 = sst [smem:[#allocation31_spill]] %s5606_s16 }
  0x11   :  { %s4830_s21 = smov 0   ;;  %s4832_s22 = smov 0  }
  0x12   :  { %s4834_s23 = smov 0   ;;  %s4836_s24 = smov 0  }
  0x13   :  { %s4838_s25 = smov 0   ;;  %s4840_s26 = smov 0  }
  0x14   :  { %s4842_s27 = smov 0   ;;  %s4844_s28 = smov 0  }
  0x15   :  { %s4846_s29 = smov 0  }
  0x16 LB: > { %5632 = sst [smem:[#allocation5_spill]] %s4706_s22  ;;  %s38_s30 = sadd.s32 1, %s4722_s26  ;;  %s4734_s29 = sphi %s4846_s29, %s26_s29   ;;  %s4730_s28 = sphi %s4844_s28, %s5680_s28   ;;  %s4726_s27 = sphi %s4842_s27, %s5679_s27   ;;  %s4722_s26 = sphi %s4840_s26, %s5678_s26   ;;  %s4718_s25 = sphi %s4838_s25, %s5677_s25   ;;  %s4714_s24 = sphi %s4836_s24, %s5676_s24   ;;  %s4710_s23 = sphi %s4834_s23, %s5675_s23   ;;  %s4706_s22 = sphi %s4832_s22, %s5674_s22   ;;  %s4702_s21 = sphi %s4830_s21, %s5673_s21  }
  0x17   : > { %5633 = sst [smem:[#allocation6_spill]] %s4722_s26  ;;  %p39_p0 = scmp.ge.s32.totalorder %s38_s30, 2 }
  0x18   : > { %5634 = sst [smem:[#allocation7_spill]] %s4726_s27  ;;  %s41_s0 = sadd.s32 1, %s4726_s27 }
  0x19   : > { %5635 = sst [smem:[#allocation8_spill]] %s4730_s28  ;;  %p311_p1 = scmp.ne.s32.totalorder %s4706_s22, %s4702_s21 }
  0x1a   : > { %5636 = sst [smem:[#allocation9_spill]] %s4734_s29  ;;  %s5682_s30 = smov (%p39_p0, %s38_s30), 0 }
  0x1b   : > { %5637 = sst [smem:[#allocation10_spill]] %s5682_s30  ;;  %s5684_s0 = smov (!%p39_p0, %s41_s0), %s4726_s27 }
  0x1c   : > { %p312_p2 = scmp.eq.s32.totalorder %s4734_s29, 0  ;;  %p43_p3 = scmp.ge.s32.totalorder %s5684_s0, 2 }
  0x1d   : > { %s45_s17 = sadd.s32 1, %s4730_s28  ;;  %s300_s18 = ssub.s32 %s4722_s26, %s5682_s30 }
  0x1e   : > { %p313_p4 = por %p312_p2, %p311_p1  ;;  %s5686_s0 = smov (%p43_p3, %s5684_s0), 0 }
  0x1f   : > { %5638 = sst [smem:[#allocation11_spill]] %s5686_s0  ;;  %s5688_s17 = smov (!%p43_p3, %s45_s17), %s4730_s28 }
  0x20   : > { %s299_s19 = ssub.s32 %s4726_s27, %s5686_s0  ;;  %s304_s20 = sadd.s32 1, %s4706_s22 }
  0x21   : > { %p47_p5 = scmp.ge.s32.totalorder %s5688_s17, 2  ;;  %s301_s3 = sor.u32 %s300_s18, %s299_s19 }
  0x22   : > { %p302_p6 = scmp.eq.s32.totalorder %s301_s3, 0  ;;  %p4091_p7 = scmp.ge.s32.totalorder %s4734_s29, 8 }
  0x23   : > { %s5690_s17 = smov (%p47_p5, %s5688_s17), 0 }
  0x24   : > { %5639 = sst [smem:[#allocation12_spill]] %s5690_s17  ;;  %503 = sbr.rel (%p4091_p7) target bundleno = 61 (0x3d), region = 24 }
  0x25   : > { %s4895_s2 = scalar_select %p302_p6, %s4706_s22, %s304_s20  }
  0x27   : > { %5640 = sst [smem:[#allocation13_spill]] %s4895_s2 }
  0x2b   : > { %564 = sbr.rel (!%p313_p4) target bundleno = 61 (0x3d), region = 60  ;;  %s566_s30 = sand.u32 (%p313_p4), 1, %s4706_s22  }
  0x2c   : > { %s4093_s16 = sshll.u32 (%p313_p4), %s4722_s26, 1  ;;  %s4092_s12 = sshll.u32 (%p313_p4), %s566_s30, 7 }
  0x2d   : > { %s4094_s28 = sshll.u32 (%p313_p4), %s4726_s27, 6  ;;  %s5641_s10 = sld [smem:[#allocation26_spill]] (%p313_p4) }
  0x2e   : > { %s571_s0 = sadd.s32 (%p313_p4), %s4094_s28, %s4093_s16  ;;  %s568_s30 = scalar_lea.vmem (%p313_p4), [#allocation4], %s4092_s12 }
  0x2f   : > { %s4095_s15 = sshll.u32 (%p313_p4), %s571_s0, 2 }
  0x33   : > { %s4904_s3 = scalar_lea.vmem %s5641_s10, %s4095_s15 }
  0x34   : > { %v631_v0 = vld [vmem:[%s4904_s3] sm:$0xff]  ;;  %v633_v1 = vld [vmem:[%s4904_s3 + $0x10] sm:$0xff] }
  0x35   : > { %v635_v2 = vld [vmem:[%s4904_s3 + $0x20] sm:$0xff]  ;;  %632 = vst [vmem:[%s568_s30] sm:$0xff] %v631_v0  ;;  %634 = vst [vmem:[%s568_s30 + $0x8] sm:$0xff] %v633_v1  ;;  %v637_v3 = vld [vmem:[%s4904_s3 + $0x30] sm:$0xff] }
  0x36   : > { %636 = vst [vmem:[%s568_s30 + $0x10] sm:$0xff] %v635_v2  ;;  %v639_v4 = vld [vmem:[%s4904_s3 + $0x40] sm:$0xff]  ;;  %v641_v5 = vld [vmem:[%s4904_s3 + $0x50] sm:$0xff]  ;;  %638 = vst [vmem:[%s568_s30 + $0x18] sm:$0xff] %v637_v3 }
  0x37   : > { %640 = vst [vmem:[%s568_s30 + $0x20] sm:$0xff] %v639_v4  ;;  %642 = vst [vmem:[%s568_s30 + $0x28] sm:$0xff] %v641_v5  ;;  %v643_v6 = vld [vmem:[%s4904_s3 + $0x60] sm:$0xff]  ;;  %v645_v7 = vld [vmem:[%s4904_s3 + $0x70] sm:$0xff] }
  0x38   : > { %v647_v8 = vld [vmem:[%s4904_s3 + $0x80] sm:$0xff]  ;;  %644 = vst [vmem:[%s568_s30 + $0x30] sm:$0xff] %v643_v6  ;;  %646 = vst [vmem:[%s568_s30 + $0x38] sm:$0xff] %v645_v7  ;;  %v649_v9 = vld [vmem:[%s4904_s3 + $0x90] sm:$0xff] }
  0x39   : > { %648 = vst [vmem:[%s568_s30 + $0x40] sm:$0xff] %v647_v8  ;;  %v651_v10 = vld [vmem:[%s4904_s3 + $0xa0] sm:$0xff]  ;;  %v653_v11 = vld [vmem:[%s4904_s3 + $0xb0] sm:$0xff]  ;;  %650 = vst [vmem:[%s568_s30 + $0x48] sm:$0xff] %v649_v9 }
  0x3a   : > { %652 = vst [vmem:[%s568_s30 + $0x50] sm:$0xff] %v651_v10  ;;  %654 = vst [vmem:[%s568_s30 + $0x58] sm:$0xff] %v653_v11  ;;  %v655_v12 = vld [vmem:[%s4904_s3 + $0xc0] sm:$0xff]  ;;  %v657_v13 = vld [vmem:[%s4904_s3 + $0xd0] sm:$0xff] }
  0x3b   : > { %v659_v14 = vld [vmem:[%s4904_s3 + $0xe0] sm:$0xff]  ;;  %656 = vst [vmem:[%s568_s30 + $0x60] sm:$0xff] %v655_v12  ;;  %658 = vst [vmem:[%s568_s30 + $0x68] sm:$0xff] %v657_v13  ;;  %v661_v15 = vld [vmem:[%s4904_s3 + $0xf0] sm:$0xff] }
  0x3c   : > { %660 = vst [vmem:[%s568_s30 + $0x70] sm:$0xff] %v659_v14  ;;  %662 = vst [vmem:[%s568_s30 + $0x78] sm:$0xff] %v661_v15 }
  0x3d PF: > { %p4096_p8 = scmp.ge.s32.totalorder %s4734_s29, 1  ;;  %p710_p9 = scmp.lt.s32.totalorder %s4734_s29, 9 }
  0x3f   : > { %p711_p10 = pnand %p4096_p8, %p710_p9 }
  0x41   : > { %714 = sbr.rel (%p711_p10) target bundleno = 3185 (0xc71), region = 118 }
  0x48   : > { %s717_s11 = sand.u32 1, %s4702_s21   ;;  %s4098_s12 = sshll.u32 %s4718_s25, 1 }
  0x49   : > { %s4926_s15 = sshll.u32 %s717_s11, 7  ;;  %p825_p11 = scmp.lt.s32.totalorder %s4098_s12, 3 }
  0x4a   : > { %p835_p12 = scmp.lt.s32.totalorder %s4714_s24, 1  ;;  %s5642_s1 = sld [smem:[#allocation17_spill]] }
  0x4b   : > { %s5692_s12 = smov (!%p825_p11, %s4098_s12), 3  ;;  %s5644_s18 = sld [smem:[#allocation16_spill]] }
  0x4c   : > { %s4932_s16 = scalar_select %p835_p12, %s4714_s24, 1 }
  0x4d   : > { %s4099_s21 = sshll.u32 %s5692_s12, 3  ;;  %s5645_s4 = sld [smem:[#allocation20_spill]] }
  0x4e   : > { %s4431_s30 = smul.u32 192, %s4932_s16  ;;  %s4222_s10 = sshll.u32 %s4932_s16, 6 }
  0x4f   : > { %s4432_s11 = smul.u32 3, %s4932_s16  ;;  %s5646_s6 = sld [smem:[#allocation22_spill]] }
  0x50   : > { %s4939_s0 = scalar_lea.vmem %s5642_s1, %s5692_s12  ;;  %s5648_s5 = sld [smem:[#allocation21_spill]] }
  0x51   : > { %5643 = sst [smem:[#allocation14_spill]] %s4939_s0  ;;  %s4944_s3 = scalar_lea.vmem %s5644_s18, %s4099_s21 }
  0x52   : > { %s4104_s22 = sshll.u32 %s4710_s23, 1  ;;  %s4106_s25 = sshll.u32 %s4710_s23, 5 }
  0x53   : > { %s4952_s26 = scalar_lea.vmem %s5645_s4, %s4431_s30  ;;  %s4105_s4 = sshll.u32 %s4932_s16, 2 }
  0x54   : > { %p862_p13 = scmp.lt.s32.totalorder %s4104_s22, 3  ;;  %p871_p0 = scmp.lt.s32.totalorder %s4106_s25, 63 }
  0x55   : > { %s4957_s12 = scalar_lea.vmem %s5646_s6, %s4222_s10  ;;  %s5653_s27 = sld [smem:[#allocation27_spill]] }
  0x56   : > { %5647 = sst [smem:[#allocation15_spill]] %s4957_s12  ;;  %s4962_s19 = scalar_lea.vmem %s5648_s5, %s4432_s11 }
  0x57   : > { %s5694_s22 = smov (!%p862_p13, %s4104_s22), 3  ;;  %s5696_s25 = smov (!%p871_p0, %s4106_s25), 63 }
  0x58   : > { %s4983_s18 = sadd.s32 %s4105_s4, %s5694_s22  ;;  %s874_s5 = sadd.s32 %s4222_s10, %s5696_s25 }
  0x59   : > { %s4108_s6 = sshll.u32 %s874_s5, 2  ;;  %s5654_s7 = sld [smem:[#allocation30_spill]] }
  0x5a   : > { %s5655_s13 = sld [smem:[#allocation28_spill]]  ;;  %s5656_s29 = sld [smem:[#allocation31_spill]] }
  0x5b   : > { %s866_s1 = scalar_lea.vmem %s5653_s27, %s4983_s18  ;;  %s5008_s17 = scalar_lea.vmem [#allocation4], %s4926_s15 }
  0x5c   : > { %p4111_p1 = scmp.ne.s32.totalorder %s4710_s23, 0 }
  0x5d   : > { %p4112_p2 = scmp.ne.s32.totalorder (!%p4111_p1), %s4714_s24, 0 }
  0x5e   : > { %897 = sbr.rel (%p4111_p1) target bundleno = 2362 (0x93a), region = 126 }
  0x5f   : > { %s886_s11 = scalar_lea.vmem %s5654_s7, %s4932_s16 }
  0x60   : > { %s5000_s4 = scalar_lea.vmem %s5655_s13, %s4108_s6  ;;  %s5005_s0 = scalar_lea.vmem %s5656_s29, %s4099_s21 }
  0x65   : > { %901 = sbr.rel (%p4112_p2) target bundleno = 418 (0x1a2), region = 130  ;;  %v902_v16 = vld [vmem:[%s4944_s3] sm:$0xff] (!%p4112_p2)  ;;  %v903_v17 = vld [vmem:[%s4944_s3 + $0x8] sm:$0xff] (!%p4112_p2)  ;;  %s5657_s7 = sld [smem:[#allocation18_spill]] (!%p4112_p2) }
  0x66   : > { %906 = vadd.xlane.f32.xlu0 (!%p4112_p2), %v902_v16  ;;  %s5658_s10 = sld [smem:[#allocation19_spill]] (!%p4112_p2) }
  0x6a   : > { %908 = vadd.xlane.f32.xlu0 (!%p4112_p2), %v903_v17 }
  0x6b   : > { %v4113_v33 = vld [vmem:[%s5657_s7] ss:$0 sm:$0xff] (!%p4112_p2) }
  0x6c   : > { %v4114_v35 = vld [vmem:[%s5658_s10] ss:$0 sm:$0xff] }
  0xf3   : > { %v907_v18 = vpop.xlane.xlu0 %906 }
  0xf4   : > { %v911_v19 = vmul.f32 0.0078125, %v907_v18 }
  0xf6   : > { %v913_v20 = vsub.f32 %v902_v16, %v911_v19 }
  0xf7   : > { %v909_v21 = vpop.xlane.xlu0 %908 }
  0xf8   : > { %v912_v22 = vmul.f32 0.0078125, %v909_v21  ;;  %v915_v23 = vmul.f32 %v913_v20, %v913_v20 }
  0xfa   : > { %v914_v24 = vsub.f32 %v903_v17, %v912_v22  ;;  %917 = vadd.xlane.f32.xlu1 %v915_v23 }
  0xfc   : > { %v916_v25 = vmul.f32 %v914_v24, %v914_v24 }
  0xfe   : > { %919 = vadd.xlane.f32.xlu1 %v916_v25 }
 0x187   : > { %v918_v26 = vpop.xlane.xlu1 %917 }
 0x188   : > { %v921_v27 = vmul.f32 0.0078125, %v918_v26 }
 0x18a   : > { %v923_v28 = vadd.f32 1e-12, %v921_v27 }
 0x18b   : > { %v920_v29 = vpop.xlane.xlu1 %919 }
 0x18c   : > { %4514 = vrsqrt.f32 %v923_v28  ;;  %v922_v30 = vmul.f32 0.0078125, %v920_v29 }
 0x18e   : > { %v924_v31 = vadd.f32 1e-12, %v922_v30 }
 0x190   : > { %4516 = vrsqrt.f32 %v924_v31 }
 0x196   : > { %v4515_v32 = vpop.eup %4514 }
 0x197   : > { %v927_v34 = vmul.f32 %v4515_v32, %v913_v20 }
 0x199   : > { %v935_v36 = vmul.f32 %v4113_v33, %v927_v34 }
 0x19a   : > { %v4517_v37 = vpop.eup %4516 }
 0x19b   : > { %v943_v38 = vadd.f32 %v4114_v35, %v935_v36  ;;  %v928_v39 = vmul.f32 %v4517_v37, %v914_v24 }
 0x19d   : > { %945 = vst [vmem:[%s5005_s0] sm:$0xff] %v943_v38  ;;  %v936_v40 = vmul.f32 %v4113_v33, %v928_v39 }
 0x19f   : > { %v944_v41 = vadd.f32 %v4114_v35, %v936_v40 }
 0x1a1   : > { %946 = vst [vmem:[%s5005_s0 + $0x8] sm:$0xff] %v944_v41 }
 0x1a2 PF: > { %v4533_v42 = vld [vmem:[%s4952_s26 + $0x4] ss:$12 sps:$4 sm:$0xff]   ;;  %v4535_v43 = vld [vmem:[%s4952_s26] ss:$12 sps:$4 sm:$0xff]   ;;  %v4736_v44 = vmov 0   ;;  %v4737_v63 = vmov 0.0   ;;  %v984_v5 = vlaneseq }
 0x1a3   : > { %1159 = vmatprep.mubr.bf16.mxu0 %v4736_v44  ;;  %1127 = vmatprep.subr.bf16.mxu0 %v4533_v42  ;;  %v4536_v45 = vld [vmem:[%s4952_s26 + $0x1c] ss:$12 sps:$4 sm:$0xff]   ;;  %v4538_v46 = vld [vmem:[%s4952_s26 + $0x18] ss:$12 sps:$4 sm:$0xff]   ;;  %v4539_v47 = vld [vmem:[%s4952_s26 + $0x34] ss:$12 sps:$4 sm:$0xff]  }
 0x1a4   : > { %1128 = vmatpush1.bf16.msra.mxu0 %v4535_v43  ;;  %v4541_v48 = vld [vmem:[%s4952_s26 + $0x30] ss:$12 sps:$4 sm:$0xff]   ;;  %v4542_v49 = vld [vmem:[%s4952_s26 + $0x4c] ss:$12 sps:$4 sm:$0xff]   ;;  %v4544_v50 = vld [vmem:[%s4952_s26 + $0x48] ss:$12 sps:$4 sm:$0xff]   ;;  %4295 = vmatprep.subr.bf16.mxu1 %v4737_v63 }
 0x1a5   : > { %1129 = vmatprep.subr.bf16.mxu0 %v4536_v45  ;;  %v4545_v51 = vld [vmem:[%s4952_s26 + $0x64] ss:$12 sps:$4 sm:$0xff]   ;;  %v4547_v52 = vld [vmem:[%s4952_s26 + $0x60] ss:$12 sps:$4 sm:$0xff]   ;;  %v4548_v53 = vld [vmem:[%s4952_s26 + $0x7c] ss:$12 sps:$4 sm:$0xff]  }
 0x1a6   : > { %v4550_v54 = vld [vmem:[%s4952_s26 + $0x78] ss:$12 sps:$4 sm:$0xff]   ;;  %v4551_v55 = vld [vmem:[%s4952_s26 + $0x94] ss:$12 sps:$4 sm:$0xff]   ;;  %v4553_v56 = vld [vmem:[%s4952_s26 + $0x90] ss:$12 sps:$4 sm:$0xff]  }
 0x1a7   : > { %v4554_v57 = vld [vmem:[%s4952_s26 + $0xac] ss:$12 sps:$4 sm:$0xff]   ;;  %v4556_v58 = vld [vmem:[%s4952_s26 + $0xa8] ss:$12 sps:$4 sm:$0xff]   ;;  %v947_v59 = vld [vmem:[%s5005_s0] sm:$0xff]  ;;  %3432 = vst [vmem:[#allocation3] sm:$0xff] %v4737_v63 }
 0x1a8   : > { %1130 = vmatpush1.bf16.msra.mxu0 %v4538_v46  ;;  %v948_v60 = vld [vmem:[%s5005_s0 + $0x8] sm:$0xff]  ;;  %3433 = vst [vmem:[#allocation3 + $0x8] sm:$0xff] %v4737_v63  ;;  %v4559_v1 = vld [vmem:[%s4952_s26 + $0x38] ss:$12 sps:$4 sm:$0xff]   ;;  %v4560_v2 = vld [vmem:[%s4952_s26 + $0x50] ss:$12 sps:$4 sm:$0xff]  }
 0x1a9   : > { %1131 = vmatprep.subr.bf16.mxu0 %v4539_v47  ;;  %v949_v61 = vpack.c.bf16 %v948_v60, %v947_v59  ;;  %v4557_v62 = vld [vmem:[%s4952_s26 + $0x8] ss:$12 sps:$4 sm:$0xff]   ;;  %v4558_v0 = vld [vmem:[%s4952_s26 + $0x20] ss:$12 sps:$4 sm:$0xff]   ;;  %v5056_v6 = vshrl.u32 %v984_v5, 7  ;;  %vm4738_vm0 = vmmov 0  }
 0x1aa   : > { %4296 = vmatpush3.bf16.msra.mxu1 %v4557_v62  ;;  %v4561_v3 = vld [vmem:[%s4952_s26 + $0x68] ss:$12 sps:$4 sm:$0xff]   ;;  %v4562_v4 = vld [vmem:[%s4952_s26 + $0x80] ss:$12 sps:$4 sm:$0xff]   ;;  %v4563_v7 = vld [vmem:[%s4952_s26 + $0x98] ss:$12 sps:$4 sm:$0xff]   ;;  %4311 = vmatprep.mubr.msk.bf16.mxu1 %vm4738_vm0, %v4737_v63 }
 0x1ab   : > { %4297 = vmatprep.subr.bf16.mxu1 %v4737_v63  ;;  %v986_v8 = vsub.s32 0, %v5056_v6  ;;  %v990_v9 = vsub.s32 1, %v5056_v6  ;;  %v5063_v10 = vld [vmem:[%s4962_s19] sm:$0x7]  ;;  %v4564_v11 = vld [vmem:[%s4952_s26 + $0xb0] ss:$12 sps:$4 sm:$0xff]  }
 0x1ac   : > { %1132 = vmatpush1.bf16.msra.mxu0 %v4541_v48  ;;  %s4739_s13 = smov 32   ;;  %s4740_s24 = smov 96   ;;  %v4742_v24 = vmov 1983009808   ;;  %v4743_v26 = vmov 1934713408  }
 0x1ad   : > { %1133 = vmatprep.subr.bf16.mxu0 %v4542_v49  ;;  %v987_v12 = vrot.slane %v5063_v10, %v986_v8  ;;  %v991_v13 = vrot.slane %v5063_v10, %v990_v9  ;;  %s4741_s26 = smov 64   ;;  %v1236_v25 = vunpack.c.l.s4 %v4742_v24  ;;  %v1268_v27 = vunpack.c.l.s4 %v4743_v26  ;;  %s5659_s15 = sld [smem:[#allocation14_spill]] }
 0x1ae   : > { %4298 = vmatpush3.bf16.msra.mxu1 %v4558_v0  ;;  %vm2113_vm1 = vcmask 261120   ;;  %vm2504_vm2 = vcmask 64512   ;;  %vm2604_vm3 = vcmask 1043456   ;;  %s5660_s21 = sld [smem:[#allocation15_spill]]  ;;  %vm3268_vm4 = vcmask 523264   ;;  %s5661_s19 = sld [smem:[#allocation23_spill]] }
 0x1af   : > { %4299 = vmatprep.subr.bf16.mxu1 %v4737_v63  ;;  %v1237_v28 = vunpack.c.0.s8 %v1236_v25  ;;  %v1269_v31 = vunpack.c.0.s8 %v1268_v27  ;;  %vm3271_vm5 = vcmask 785408   ;;  %s5663_s20 = sld [smem:[#allocation24_spill]]  ;;  %s5665_s29 = sld [smem:[#allocation25_spill]] }
 0x1b0   : > { %1134 = vmatpush1.bf16.msra.mxu0 %v4544_v50 }
 0x1b1   : > { %1135 = vmatprep.subr.bf16.mxu0 %v4545_v51  ;;  %v5098_v32 = vsub.s32 %v1237_v28, %v5056_v6  ;;  %v5101_v39 = vsub.s32 %v1269_v31, %v5056_v6 }
 0x1b2   : > { %4300 = vmatpush3.bf16.msra.mxu1 %v4559_v1 }
 0x1b3   : > { %4301 = vmatprep.subr.bf16.mxu1 %v4737_v63 }
 0x1b4   : > { %1136 = vmatpush1.bf16.msra.mxu0 %v4547_v52  ;;  %s5662_s27 = scalar_lea.vmem %s5661_s19, %s4932_s16 }
 0x1b5   : > { %1137 = vmatprep.subr.bf16.mxu0 %v4548_v53  ;;  %s5664_s30 = scalar_lea.vmem %s5663_s20, %s4932_s16  ;;  %s5666_s5 = scalar_lea.vmem %s5665_s29, %s4932_s16 }
 0x1b6   : > { %4302 = vmatpush3.bf16.msra.mxu1 %v4560_v2 }
 0x1b7   : > { %4303 = vmatprep.subr.bf16.mxu1 %v4737_v63 }
 0x1b8   : > { %1138 = vmatpush1.bf16.msra.mxu0 %v4550_v54 }
 0x1b9   : > { %1139 = vmatprep.subr.bf16.mxu0 %v4551_v55 }
 0x1ba   : > { %4304 = vmatpush3.bf16.msra.mxu1 %v4561_v3 }
 0x1bb   : > { %4305 = vmatprep.subr.bf16.mxu1 %v4737_v63 }
 0x1bc   : > { %1140 = vmatpush1.bf16.msra.mxu0 %v4553_v56 }
 0x1bd   : > { %1141 = vmatprep.subr.bf16.mxu0 %v4554_v57 }
 0x1be   : > { %4306 = vmatpush3.bf16.msra.mxu1 %v4562_v4 }
 0x1bf   : > { %4307 = vmatprep.subr.bf16.mxu1 %v4737_v63 }
 0x1c0   : > { %1142 = vmatpush1.bf16.msra.mxu0 %v4556_v58 }
 0x1c1   : > { %4339 = vmatprep.subr.bf16.mxu0 %v4737_v63 }
 0x1c2   : > { %4308 = vmatpush3.bf16.msra.mxu1 %v4563_v7 }
 0x1c3   : > { %1160 = vmatmul.mubr.bf16.vlgmr.msra.gmra.mrb[0].mxu0 %v949_v61  ;;  %4309 = vmatprep.subr.bf16.mxu1 %v4737_v63 }
 0x1c4   : > { %4341 = vmatprep.mubr.msk.bf16.mxu0 %vm4738_vm0, %v4737_v63 }
 0x1c6   : > { %4310 = vmatpush3.bf16.msra.mxu1 %v4564_v11 }
 0x1c7   : > { %4315 = vmatprep.subr.bf16.mxu1 %v4737_v63 }
 0x1c9   : > { %4312 = vmatmul.mubr.bf16.vlgmr.msra.gmra.mrb[0].mxu1 %v949_v61 }
 0x1ca   : > { %4317 = vmatprep.mubr.msk.bf16.mxu1 %vm4738_vm0, %v4737_v63 }
 0x296   : > { %v1161_v14 = vpop.f32.mrb[0].mxu0 }
 0x297   : > { %v1163_v15 = vpop.f32.mrb[1].mxu0  ;;  %v1162_v16 = vadd.f32 %v1161_v14, %v987_v12 }
 0x298   : > { %v1164_v17 = vadd.f32 %v1163_v15, %v991_v13  ;;  %v1165_v18 = vpop.f32.mrb[2].mxu0 }
 0x299   : > { %v1167_v19 = vpop.f32.mrb[3].mxu0  ;;  %v1211_v20 = vmul.f32 0.17677669, %v1162_v16  ;;  %v1166_v21 = vadd.f32 %v1165_v18, %v987_v12 }
 0x29a   : > { %1527 = vrot.lane.b32.xlu1 %v1164_v17, %s4739_s13  ;;  %1515 = vrot.lane.b32.xlu0 %v1164_v17, %s4740_s24  ;;  %v5081_v22 = vadd.f32 %v1167_v19, %v991_v13 }
 0x29b   : > { %v5087_v23 = vmul.f32 0.17677669, %v1166_v21 }
 0x29e   : > { %1521 = vrot.lane.b32.xlu0 %v1164_v17, %s4741_s26  ;;  %1215 = vrot.lane.b32.xlu1 %v1211_v20, %s4740_s24 }
 0x2a2   : > { %1221 = vrot.lane.b32.xlu0 %v1211_v20, %s4741_s26  ;;  %1227 = vrot.lane.b32.xlu1 %v1211_v20, %s4739_s13 }
 0x2a6   : > { %1517 = vrot.lane.b32.xlu0 %v5081_v22, %s4740_s24  ;;  %1523 = vrot.lane.b32.xlu1 %v5081_v22, %s4741_s26 }
 0x2aa   : > { %1529 = vrot.lane.b32.xlu0 %v5081_v22, %s4739_s13  ;;  %1217 = vrot.lane.b32.xlu1 %v5087_v23, %s4740_s24 }
 0x2ae   : > { %1223 = vrot.lane.b32.xlu0 %v5087_v23, %s4741_s26  ;;  %1229 = vrot.lane.b32.xlu1 %v5087_v23, %s4739_s13 }
 0x30c   : > { %v1528_v29 = vpop.permute.xlu1 %1527  ;;  %v1516_v30 = vpop.permute.xlu0 %1515 }
 0x30d   : > { %v1549_v33 = vcombine.low %v1516_v30, %v1528_v29  ;;  %v1550_v34 = vcombine.high %v1516_v30, %v1528_v29 }
 0x30f   : > { %v1557_v40 = vrot.slane %v1549_v33, %v5098_v32  ;;  %v1564_v41 = vrot.slane %v1550_v34, %v5098_v32 }
 0x310   : > { %v1522_v35 = vpop.permute.xlu0 %1521  ;;  %v1216_v36 = vpop.permute.xlu1 %1215 }
 0x311   : > { %v1533_v37 = vcombine.low %v1164_v17, %v1522_v35  ;;  %v1534_v38 = vcombine.high %v1164_v17, %v1522_v35 }
 0x313   : > { %v1541_v42 = vrot.slane %v1533_v37, %v5098_v32  ;;  %v1548_v43 = vrot.slane %v1534_v38, %v5098_v32 }
 0x314   : > { %v1222_v44 = vpop.permute.xlu0 %1221  ;;  %v1228_v45 = vpop.permute.xlu1 %1227 }
 0x315   : > { %v1565_v46 = vcombine.low %v1541_v42, %v1557_v40  ;;  %v1566_v47 = vcombine.high %v1541_v42, %v1557_v40  ;;  %v1581_v48 = vcombine.low %v1548_v43, %v1564_v41  ;;  %v1582_v49 = vcombine.high %v1548_v43, %v1564_v41 }
 0x316   : > { %v1233_v50 = vcombine.low %v1211_v20, %v1222_v44  ;;  %v1234_v51 = vcombine.high %v1211_v20, %v1222_v44  ;;  %v1249_v52 = vcombine.low %v1216_v36, %v1228_v45  ;;  %v1250_v53 = vcombine.high %v1216_v36, %v1228_v45 }
 0x317   : > { %v1573_v54 = vrot.slane %v1565_v46, %v5101_v39  ;;  %v1580_v55 = vrot.slane %v1566_v47, %v5101_v39  ;;  %v1589_v56 = vrot.slane %v1581_v48, %v5101_v39  ;;  %v1596_v57 = vrot.slane %v1582_v49, %v5101_v39 }
 0x318   : > { %v1241_v58 = vrot.slane %v1233_v50, %v5098_v32  ;;  %v1248_v59 = vrot.slane %v1234_v51, %v5098_v32  ;;  %v1257_v60 = vrot.slane %v1249_v52, %v5098_v32  ;;  %v1264_v61 = vrot.slane %v1250_v53, %v5098_v32  ;;  %v1518_v62 = vpop.permute.xlu0 %1517  ;;  %v1524_v0 = vpop.permute.xlu1 %1523 }
 0x319   : > { %v1669_v5 = vcombine.low %v1573_v54, %v1580_v55  ;;  %v4143_v7 = vcombine.high %v1573_v54, %v1580_v55  ;;  %v1685_v8 = vcombine.low %v1589_v56, %v1596_v57  ;;  %v1601_v16 = vcombine.low %v5081_v22, %v1524_v0 }
 0x31a   : > { %v1265_v1 = vcombine.low %v1241_v58, %v1257_v60  ;;  %v1266_v2 = vcombine.high %v1241_v58, %v1257_v60  ;;  %v1281_v3 = vcombine.low %v1248_v59, %v1264_v61  ;;  %v1282_v4 = vcombine.high %v1248_v59, %v1264_v61 }
 0x31b   : > { %v1602_v17 = vcombine.high %v5081_v22, %v1524_v0  ;;  %v4144_v20 = vcombine.high %v1589_v56, %v1596_v57  ;;  %v1609_v26 = vrot.slane %v1601_v16, %v5098_v32  ;;  %v5126_v30 = vrot.slane %v1669_v5, %v5098_v32 }
 0x31c   : > { %v1273_v9 = vrot.slane %v1265_v1, %v5101_v39  ;;  %v1280_v11 = vrot.slane %v1266_v2, %v5101_v39  ;;  %v1289_v12 = vrot.slane %v1281_v3, %v5101_v39  ;;  %v1296_v13 = vrot.slane %v1282_v4, %v5101_v39  ;;  %v1530_v14 = vpop.permute.xlu0 %1529  ;;  %v1218_v15 = vpop.permute.xlu1 %1217 }
 0x31d   : > { %v1617_v18 = vcombine.low %v1518_v62, %v1530_v14  ;;  %v1618_v19 = vcombine.high %v1518_v62, %v1530_v14  ;;  %v1616_v27 = vrot.slane %v1602_v17, %v5098_v32  ;;  %v5129_v31 = vrot.slane %v4143_v7, %v5098_v32 }
 0x31e   : > { %v1369_v21 = vcombine.low %v1273_v9, %v1280_v11  ;;  %v4139_v24 = vcombine.high %v1273_v9, %v1280_v11  ;;  %v1385_v25 = vcombine.low %v1289_v12, %v1296_v13  ;;  %v5132_v22 = vrot.slane %v1685_v8, %v5098_v32 }
 0x31f   : > { %v1625_v28 = vrot.slane %v1617_v18, %v5098_v32  ;;  %v1632_v29 = vrot.slane %v1618_v19, %v5098_v32  ;;  %v4140_v33 = vcombine.high %v1289_v12, %v1296_v13  ;;  %v5135_v41 = vrot.slane %v4144_v20, %v5098_v32 }
 0x320   : > { %v1224_v38 = vpop.permute.xlu0 %1223  ;;  %v1230_v40 = vpop.permute.xlu1 %1229  ;;  %v5138_v42 = vrot.slane %v1369_v21, %v5098_v32  ;;  %v5141_v43 = vrot.slane %v4139_v24, %v5098_v32  ;;  %v5144_v44 = vrot.slane %v1385_v25, %v5098_v32  ;;  %v1701_v8 = vcombine.low %v5126_v30, %v5129_v31 }
 0x321   : > { %v1633_v34 = vcombine.low %v1609_v26, %v1625_v28  ;;  %v1634_v35 = vcombine.high %v1609_v26, %v1625_v28  ;;  %v1649_v36 = vcombine.low %v1616_v27, %v1632_v29  ;;  %v1650_v37 = vcombine.high %v1616_v27, %v1632_v29 }
 0x322   : > { %v1301_v49 = vcombine.low %v5087_v23, %v1224_v38  ;;  %v1302_v50 = vcombine.high %v5087_v23, %v1224_v38  ;;  %v1317_v51 = vcombine.low %v1218_v15, %v1230_v40  ;;  %v1318_v52 = vcombine.high %v1218_v15, %v1230_v40 }
 0x323   : > { %v1641_v45 = vrot.slane %v1633_v34, %v5101_v39  ;;  %v1648_v46 = vrot.slane %v1634_v35, %v5101_v39  ;;  %v1657_v47 = vrot.slane %v1649_v36, %v5101_v39  ;;  %v1664_v48 = vrot.slane %v1650_v37, %v5101_v39 }
 0x324   : > { %v5153_v53 = vrot.slane %v4140_v33, %v5098_v32  ;;  %v1309_v57 = vrot.slane %v1301_v49, %v5098_v32  ;;  %v1316_v58 = vrot.slane %v1302_v50, %v5098_v32  ;;  %v1325_v59 = vrot.slane %v1317_v51, %v5098_v32 }
 0x325   : > { %v1737_v54 = vcombine.low %v1641_v45, %v1648_v46  ;;  %v4145_v55 = vcombine.high %v1641_v45, %v1648_v46  ;;  %v1753_v56 = vcombine.low %v1657_v47, %v1664_v48  ;;  %v1332_v60 = vrot.slane %v1318_v52, %v5098_v32 }
 0x326   : > { %v1401_v61 = vcombine.low %v5138_v42, %v5141_v43  ;;  %v4146_v0 = vcombine.high %v1657_v47, %v1664_v48  ;;  %v1333_v1 = vcombine.low %v1309_v57, %v1325_v59  ;;  %v1334_v2 = vcombine.high %v1309_v57, %v1325_v59 }
 0x327   : > { %v1744_v23 = vrot.slane %v1737_v54, %v5098_v32  ;;  %v1752_v62 = vrot.slane %v4145_v55, %v5098_v32  ;;  %v1349_v3 = vcombine.low %v1316_v58, %v1332_v60  ;;  %v1350_v4 = vcombine.high %v1316_v58, %v1332_v60 }
 0x328   : > { %v1417_v5 = vcombine.low %v5144_v44, %v5153_v53  ;;  %v1760_v7 = vrot.slane %v1753_v56, %v5098_v32  ;;  %v1717_v9 = vcombine.low %v5132_v22, %v5135_v41  ;;  %v1341_v11 = vrot.slane %v1333_v1, %v5101_v39 }
 0x329   : > { %v1348_v12 = vrot.slane %v1334_v2, %v5101_v39  ;;  %v1357_v13 = vrot.slane %v1349_v3, %v5101_v39  ;;  %v1364_v14 = vrot.slane %v1350_v4, %v5101_v39  ;;  %v1768_v15 = vrot.slane %v4146_v0, %v5098_v32 }
 0x32a   : > { %v1709_v16 = vrot.slane %v1701_v8, %v5101_v39  ;;  %v1725_v17 = vrot.slane %v1717_v9, %v5101_v39  ;;  %v1769_v18 = vcombine.low %v1744_v23, %v1752_v62  ;;  %v1409_v26 = vrot.slane %v1401_v61, %v5101_v39 }
 0x32b   : > { %v1437_v19 = vcombine.low %v1341_v11, %v1348_v12  ;;  %v4141_v20 = vcombine.high %v1341_v11, %v1348_v12  ;;  %v1453_v21 = vcombine.low %v1357_v13, %v1364_v14  ;;  %v4142_v24 = vcombine.high %v1357_v13, %v1364_v14 }
 0x32c   : > { %v1733_v25 = vcombine.low %v1709_v16, %v1725_v17  ;;  %v1425_v35 = vrot.slane %v1417_v5, %v5101_v39  ;;  %v5184_v36 = vrot.slane %v1769_v18, %v5101_v39  ;;  %v1785_v37 = vcombine.low %v1760_v7, %v1768_v15 }
 0x32d   : > { %v1444_v27 = vrot.slane %v1437_v19, %v5098_v32  ;;  %v1452_v28 = vrot.slane %v4141_v20, %v5098_v32  ;;  %v1460_v29 = vrot.slane %v1453_v21, %v5098_v32  ;;  %v1468_v33 = vrot.slane %v4142_v24, %v5098_v32 }
 0x32e   : > { %v1805_v34 = vpack.c.bf16 %v1733_v25, %v1733_v25  ;;  %v1734_v45 = vcombine.high %v1709_v16, %v1725_v17  ;;  %v1793_v47 = vrot.slane %v1785_v37, %v5101_v39  ;;  %v1702_v48 = vcombine.high %v5126_v30, %v5129_v31 }
 0x32f   : > { %v1469_v38 = vcombine.low %v1444_v27, %v1452_v28  ;;  %v1485_v40 = vcombine.low %v1460_v29, %v1468_v33  ;;  %v1718_v49 = vcombine.high %v5132_v22, %v5135_v41  ;;  %v1433_v50 = vcombine.low %v1409_v26, %v1425_v35 }
 0x330   : > { %v2118_v46 = vsel %vm2113_vm1, %v1805_v34, 0  ;;  %v1801_v51 = vcombine.low %v5184_v36, %v1793_v47  ;;  %v1770_v52 = vcombine.high %v1744_v23, %v1752_v62  ;;  %v1786_v54 = vcombine.high %v1760_v7, %v1768_v15 }
 0x331   : > { %4316 = vmatpush3.bf16.xpose.msra.mxu1 %v2118_v46  ;;  %v1806_v55 = vpack.c.bf16 %v1734_v45, %v1734_v45  ;;  %v1716_v56 = vrot.slane %v1702_v48, %v5101_v39  ;;  %v5196_v57 = vrot.slane %v1469_v38, %v5101_v39  ;;  %v1493_v58 = vrot.slane %v1485_v40, %v5101_v39  ;;  %v1204_v45 = vpop.f32.mrb[0].mxu1 }
 0x332   : > { %4321 = vmatprep.subr.bf16.mxu1 %v4737_v63  ;;  %v1809_v59 = vpack.c.bf16 %v1801_v51, %v1801_v51  ;;  %v1732_v30 = vrot.slane %v1718_v49, %v5101_v39  ;;  %v1784_v31 = vrot.slane %v1770_v52, %v5101_v39  ;;  %v1800_v22 = vrot.slane %v1786_v54, %v5101_v39  ;;  %v4159_v51 = vld [vmem:[%s5659_s15] ss:$0 sm:$0xff] }
 0x333   : > { %v1505_v41 = vpack.c.bf16 %v1433_v50, %v1433_v50  ;;  %v1470_v23 = vcombine.high %v1444_v27, %v1452_v28  ;;  %v1486_v62 = vcombine.high %v1460_v29, %v1468_v33  ;;  %v2164_v0 = vsel %vm2113_vm1, %v1806_v55, 0 }
 0x334   : > { %v2302_v60 = vsel %vm2113_vm1, %v1809_v59, 0  ;;  %v1803_v61 = vcombine.low %v1784_v31, %v1800_v22  ;;  %v1735_v1 = vcombine.low %v1716_v56, %v1732_v30  ;;  %v1501_v2 = vcombine.low %v5196_v57, %v1493_v58 }
 0x335   : > { %4340 = vmatpush3.bf16.xpose.msra.mxu0 %v2302_v60  ;;  %v1402_v3 = vcombine.high %v5138_v42, %v5141_v43  ;;  %v1418_v4 = vcombine.high %v5144_v44, %v5153_v53  ;;  %v1434_v5 = vcombine.high %v1409_v26, %v1425_v35  ;;  %v1484_v11 = vrot.slane %v1470_v23, %v5101_v39 }
 0x336   : > { %4351 = vmatprep.subr.bf16.mxu0 %v4737_v63  ;;  %v1811_v7 = vpack.c.bf16 %v1803_v61, %v1803_v61  ;;  %v1807_v8 = vpack.c.bf16 %v1735_v1, %v1735_v1  ;;  %v1509_v9 = vpack.c.bf16 %v1501_v2, %v1501_v2  ;;  %v1500_v12 = vrot.slane %v1486_v62, %v5101_v39 }
 0x337   : > { %v1506_v13 = vpack.c.bf16 %v1434_v5, %v1434_v5  ;;  %v1416_v42 = vrot.slane %v1402_v3, %v5101_v39  ;;  %v1432_v43 = vrot.slane %v1418_v4, %v5101_v39  ;;  %v1736_v53 = vcombine.high %v1716_v56, %v1732_v30 }
 0x338   : > { %4318 = vmatmul.mubr.msk.bf16.vlgmr.msra.gmra.mrb[4].mxu1 %vm2113_vm1, %v1505_v41  ;;  %v2394_v14 = vsel %vm2113_vm1, %v1811_v7, 0  ;;  %v2210_v44 = vsel %vm2113_vm1, %v1807_v8, 0  ;;  %v1503_v15 = vcombine.low %v1484_v11, %v1500_v12  ;;  %v1802_v21 = vcombine.high %v5184_v36, %v1793_v47  ;;  %v4313_v47 = vpop.f32.mrb[1].mxu1 }
 0x339   : > { %4322 = vmatpush3.bf16.xpose.msra.mxu1 %v2164_v0  ;;  %4323 = vmatprep.mubr.msk.bf16.mxu1 %vm4738_vm0, %v4737_v63  ;;  %v1435_v16 = vcombine.low %v1416_v42, %v1432_v43  ;;  %v1808_v17 = vpack.c.bf16 %v1736_v53, %v1736_v53  ;;  %v1436_v24 = vcombine.high %v1416_v42, %v1432_v43  ;;  %v994_v38 = vsub.s32 2, %v5056_v6  ;;  %v1207_v48 = vpop.f32.mrb[2].mxu1 }
 0x33a   : > { %4327 = vmatprep.subr.bf16.mxu1 %v4737_v63  ;;  %v1511_v18 = vpack.c.bf16 %v1503_v15, %v1503_v15  ;;  %v1810_v25 = vpack.c.bf16 %v1802_v21, %v1802_v21  ;;  %v1804_v28 = vcombine.high %v1784_v31, %v1800_v22  ;;  %v1502_v29 = vcombine.high %v5196_v57, %v1493_v58  ;;  %v4314_v50 = vpop.f32.mrb[3].mxu1  ;;  %v4160_v57 = vld [vmem:[%s5659_s15 + $0x1] ss:$0 sm:$0xff] }
 0x33b   : > { %v1507_v19 = vpack.c.bf16 %v1435_v16, %v1435_v16  ;;  %v2256_v20 = vsel %vm2113_vm1, %v1808_v17, 0  ;;  %v1508_v26 = vpack.c.bf16 %v1436_v24, %v1436_v24  ;;  %v1504_v36 = vcombine.high %v1484_v11, %v1500_v12 }
 0x33c   : > { %4342 = vmatmul.mubr.msk.bf16.vlgmr.msra.gmra.mrb[4].mxu0 %vm2113_vm1, %v1509_v9  ;;  %v2348_v27 = vsel %vm2113_vm1, %v1810_v25, 0  ;;  %v1812_v33 = vpack.c.bf16 %v1804_v28, %v1804_v28  ;;  %v1510_v34 = vpack.c.bf16 %v1502_v29, %v1502_v29  ;;  %v995_v40 = vrot.slane %v5063_v10, %v994_v38 }
 0x33d   : > { %4352 = vmatpush3.bf16.xpose.msra.mxu0 %v2394_v14  ;;  %4353 = vmatprep.mubr.msk.bf16.mxu0 %vm4738_vm0, %v4737_v63  ;;  %v1512_v37 = vpack.c.bf16 %v1504_v36, %v1504_v36 }
 0x33e   : > { %4363 = vmatprep.subr.bf16.mxu0 %v4737_v63  ;;  %v2440_v35 = vsel %vm2113_vm1, %v1812_v33, 0  ;;  %v5253_v46 = vadd.f32 %v1204_v45, %v995_v40  ;;  %v5257_v49 = vadd.f32 %v1207_v48, %v995_v40 }
 0x340   : > { %4324 = vmatmul.mubr.msk.bf16.vlgmr.msra.gmra.mrb[8].mxu1 %vm2113_vm1, %v1506_v13  ;;  %1815 = vrot.lane.b32.xlu1 %v5253_v46, %s4740_s24 }
 0x341   : > { %4328 = vmatpush3.bf16.xpose.msra.mxu1 %v2210_v44  ;;  %4329 = vmatprep.mubr.msk.bf16.mxu1 %vm4738_vm0, %v4737_v63 }
 0x342   : > { %4333 = vmatprep.subr.bf16.mxu1 %v4737_v63 }
 0x344   : > { %4354 = vmatmul.mubr.msk.bf16.vlgmr.msra.gmra.mrb[8].mxu0 %vm2113_vm1, %v1511_v18 }
 0x345   : > { %4365 = vmatprep.mubr.msk.bf16.mxu0 %vm4738_vm0, %v4737_v63 }
 0x348   : > { %4330 = vmatmul.mubr.msk.bf16.vlgmr.msra.gmra.mrb[12].mxu1 %vm2113_vm1, %v1507_v19 }
 0x349   : > { %4334 = vmatpush3.bf16.xpose.msra.mxu1 %v2256_v20  ;;  %4335 = vmatprep.mubr.msk.bf16.mxu1 %vm4738_vm0, %v4737_v63 }
 0x34a   : > { %4345 = vmatprep.subr.bf16.mxu1 %v4737_v63 }
 0x350   : > { %4336 = vmatmul.mubr.msk.bf16.vlgmr.msra.gmra.mrb[16].mxu1 %vm2113_vm1, %v1508_v26 }
 0x351   : > { %4346 = vmatpush3.bf16.xpose.msra.mxu1 %v2348_v27  ;;  %4347 = vmatprep.mubr.msk.bf16.mxu1 %vm4738_vm0, %v4737_v63 }
 0x352   : > { %4357 = vmatprep.subr.bf16.mxu1 %v4737_v63 }
 0x358   : > { %4348 = vmatmul.mubr.msk.bf16.vlgmr.msra.gmra.mrb[20].mxu1 %vm2113_vm1, %v1510_v34 }
 0x359   : > { %4358 = vmatpush3.bf16.xpose.msra.mxu1 %v2440_v35  ;;  %4359 = vmatprep.mubr.msk.bf16.mxu1 %vm4738_vm0, %v4737_v63 }
 0x35a   : > { %4369 = vmatprep.subr.bf16.mxu1 %v4737_v63 }
 0x360   : > { %4360 = vmatmul.mubr.msk.bf16.vlgmr.msra.gmra.mrb[24].mxu1 %vm2113_vm1, %v1512_v37 }
 0x361   : > { %4371 = vmatprep.mubr.msk.bf16.mxu1 %vm4738_vm0, %v4737_v63 }
 0x3b2   : > { %v1816_v37 = vpop.permute.xlu1 %1815 }
 0x40b   : > { %v2154_v52 = vpop.f32.mrb[4].mxu1 }
 0x40c   : > { %v2496_v54 = vadd.f32 %v4159_v51, %v2154_v52  ;;  %v4319_v55 = vpop.f32.mrb[5].mxu1 }
 0x40d   : > { %v2157_v6 = vpop.f32.mrb[6].mxu1 }
 0x40e   : > { %v4320_v56 = vpop.f32.mrb[7].mxu1  ;;  %v2505_v10 = vsel %vm2504_vm2, %v2496_v54, -inf }
 0x40f   : > { %2506 = vmax.xlane.f32.xlu0 %v2505_v10  ;;  %v2338_v58 = vpop.f32.mrb[4].mxu0 }
 0x410   : > { %v2500_v59 = vadd.f32 %v4160_v57, %v2338_v58  ;;  %v4343_v30 = vpop.f32.mrb[5].mxu0 }
 0x411   : > { %v2341_v22 = vpop.f32.mrb[6].mxu0 }
 0x412   : > { %v4344_v61 = vpop.f32.mrb[7].mxu0  ;;  %v2517_v23 = vsel %vm2504_vm2, %v2500_v59, -inf }
 0x413   : > { %v2200_v31 = vpop.f32.mrb[8].mxu1  ;;  %2518 = vmax.xlane.f32.xlu1 %v2517_v23 }
 0x414   : > { %v2497_v41 = vadd.f32 %v4159_v51, %v2200_v31  ;;  %v4325_v60 = vpop.f32.mrb[9].mxu1 }
 0x415   : > { %v2203_v62 = vpop.f32.mrb[10].mxu1 }
 0x416   : > { %v4326_v0 = vpop.f32.mrb[11].mxu1  ;;  %v2508_v1 = vsel %vm2504_vm2, %v2497_v41, -inf }
 0x417   : > { %2509 = vmax.xlane.f32.xlu1 %v2508_v1  ;;  %v2430_v2 = vpop.f32.mrb[8].mxu0 }
 0x418   : > { %v5264_v3 = vadd.f32 %v4160_v57, %v2430_v2  ;;  %v4355_v4 = vpop.f32.mrb[9].mxu0 }
 0x419   : > { %v2433_v7 = vpop.f32.mrb[10].mxu0 }
 0x41a   : > { %v4356_v11 = vpop.f32.mrb[11].mxu0  ;;  %v2523_v12 = vsel %vm2504_vm2, %v5264_v3, -inf }
 0x41b   : > { %v2246_v5 = vpop.f32.mrb[12].mxu1  ;;  %2524 = vmax.xlane.f32.xlu1 %v2523_v12 }
 0x41c   : > { %v2498_v8 = vadd.f32 %v4159_v51, %v2246_v5  ;;  %v4331_v9 = vpop.f32.mrb[13].mxu1 }
 0x41d   : > { %v2249_v13 = vpop.f32.mrb[14].mxu1 }
 0x41e   : > { %v4332_v14 = vpop.f32.mrb[15].mxu1  ;;  %v2511_v42 = vsel %vm2504_vm2, %v2498_v8, -inf }
 0x41f   : > { %2512 = vmax.xlane.f32.xlu0 %v2511_v42 }
 0x423   : > { %v2292_v43 = vpop.f32.mrb[16].mxu1 }
 0x424   : > { %v2499_v44 = vadd.f32 %v4159_v51, %v2292_v43  ;;  %v4337_v53 = vpop.f32.mrb[17].mxu1 }
 0x425   : > { %v2295_v15 = vpop.f32.mrb[18].mxu1 }
 0x426   : > { %v4338_v16 = vpop.f32.mrb[19].mxu1  ;;  %v2514_v17 = vsel %vm2504_vm2, %v2499_v44, -inf }
 0x427   : > { %2515 = vmax.xlane.f32.xlu0 %v2514_v17 }
 0x42b   : > { %v2384_v18 = vpop.f32.mrb[20].mxu1 }
 0x42c   : > { %v5270_v19 = vadd.f32 %v4160_v57, %v2384_v18  ;;  %v4349_v20 = vpop.f32.mrb[21].mxu1  ;;  %1827 = vrot.lane.b32.xlu1 %v5253_v46, %s4739_s13 }
 0x42d   : > { %v2387_v21 = vpop.f32.mrb[22].mxu1 }
 0x42e   : > { %v4350_v24 = vpop.f32.mrb[23].mxu1  ;;  %v2520_v25 = vsel %vm2504_vm2, %v5270_v19, -inf }
 0x42f   : > { %2521 = vmax.xlane.f32.xlu0 %v2520_v25 }
 0x433   : > { %v2476_v26 = vpop.f32.mrb[24].mxu1 }
 0x434   : > { %v5276_v27 = vadd.f32 %v4160_v57, %v2476_v26  ;;  %v4361_v28 = vpop.f32.mrb[25].mxu1 }
 0x435   : > { %v2479_v29 = vpop.f32.mrb[26].mxu1 }
 0x436   : > { %v4362_v33 = vpop.f32.mrb[27].mxu1  ;;  %v2526_v34 = vsel %vm2504_vm2, %v5276_v27, -inf }
 0x437   : > { %2527 = vmax.xlane.f32.xlu0 %v2526_v34 }
 0x44d   : > { %1821 = vrot.lane.b32.xlu0 %v5253_v46, %s4741_s26 }
 0x49c   : > { %v2507_v35 = vpop.xlane.xlu0 %2506 }
 0x49d   : > { %v2529_v36 = vsub.f32 %v2496_v54, %v2507_v35 }
 0x49f   : > { %v2537_v38 = vmul.f32 1.442695, %v2529_v36 }
 0x4a0   : > { %v2519_v40 = vpop.xlane.xlu1 %2518 }
 0x4a1   : > { %4573 = vpow2.f32 %v2537_v38  ;;  %v2533_v45 = vsub.f32 %v2500_v59, %v2519_v40 }
 0x4a3   : > { %v2545_v47 = vmul.f32 1.442695, %v2533_v45 }
 0x4a4   : > { %v2510_v48 = vpop.xlane.xlu1 %2509 }
 0x4a5   : > { %4575 = vpow2.f32 %v2545_v47  ;;  %v2530_v50 = vsub.f32 %v2497_v41, %v2510_v48 }
 0x4a7   : > { %v2539_v51 = vmul.f32 1.442695, %v2530_v50 }
 0x4a8   : > { %v2525_v61 = vpop.xlane.xlu1 %2524 }
 0x4a9   : > { %4577 = vpow2.f32 %v2539_v51 }
 0x4ab   : > { %v5282_v52 = vpop.eup %4573 }
 0x4ac   : > { %v2513_v55 = vpop.xlane.xlu0 %2512  ;;  %v2553_v6 = vsel %vm2504_vm2, %v5282_v52, 0.0  ;;  %v1828_v0 = vpop.permute.xlu1 %1827 }
 0x4ad   : > { %v2531_v56 = vsub.f32 %v2498_v8, %v2513_v55  ;;  %2554 = vadd.xlane.f32.xlu1 %v2553_v6  ;;  %v1849_v4 = vcombine.low %v1816_v37, %v1828_v0  ;;  %v1850_v5 = vcombine.high %v1816_v37, %v1828_v0 }
 0x4af   : > { %v2541_v54 = vmul.f32 1.442695, %v2531_v56  ;;  %v5286_v10 = vpop.eup %4575  ;;  %v1857_v11 = vrot.slane %v1849_v4, %v5098_v32  ;;  %v1864_v12 = vrot.slane %v1850_v5, %v5098_v32 }
 0x4b0   : > { %v2565_v57 = vsel %vm2504_vm2, %v5286_v10, 0.0 }
 0x4b1   : > { %4579 = vpow2.f32 %v2541_v54  ;;  %2566 = vadd.xlane.f32.xlu0 %v2565_v57 }
 0x4b3   : > { %v5290_v59 = vpop.eup %4577 }
 0x4b4   : > { %v2516_v58 = vpop.xlane.xlu0 %2515  ;;  %v2556_v31 = vsel %vm2504_vm2, %v5290_v59, 0.0 }
 0x4b5   : > { %v2532_v30 = vsub.f32 %v2499_v44, %v2516_v58  ;;  %2557 = vadd.xlane.f32.xlu0 %v2556_v31 }
 0x4b7   : > { %v2543_v22 = vmul.f32 1.442695, %v2532_v30  ;;  %v2535_v30 = vsub.f32 %v5264_v3, %v2525_v61 }
 0x4b9   : > { %4581 = vpow2.f32 %v2543_v22  ;;  %v2549_v31 = vmul.f32 1.442695, %v2535_v30 }
 0x4bb   : > { %v5294_v41 = vpop.eup %4579 }
 0x4bc   : > { %v2559_v60 = vsel %vm2504_vm2, %v5294_v41, 0.0  ;;  %v2522_v23 = vpop.xlane.xlu0 %2521 }
 0x4bd   : > { %2560 = vadd.xlane.f32.xlu1 %v2559_v60  ;;  %v2534_v56 = vsub.f32 %v5270_v19, %v2522_v23 }
 0x4bf   : > { %v2547_v58 = vmul.f32 1.442695, %v2534_v56 }
 0x4c1   : > { %4583 = vpow2.f32 %v2547_v58 }
 0x4c2   : > { %4585 = vpow2.f32 %v2549_v31 }
 0x4c3   : > { %v5298_v62 = vpop.eup %4581 }
 0x4c4   : > { %v5300_v1 = vpop.xlane.xlu0 %2527  ;;  %v2562_v2 = vsel %vm2504_vm2, %v5298_v62, 0.0 }
 0x4c5   : > { %2563 = vadd.xlane.f32.xlu0 %v2562_v2  ;;  %v2536_v3 = vsub.f32 %v5276_v27, %v5300_v1 }
 0x4c7   : > { %v2551_v61 = vmul.f32 1.442695, %v2536_v3 }
 0x4c8   : > { %v1822_v7 = vpop.permute.xlu0 %1821 }
 0x4c9   : > { %v1833_v8 = vcombine.low %v5253_v46, %v1822_v7  ;;  %v1834_v9 = vcombine.high %v5253_v46, %v1822_v7  ;;  %4587 = vpow2.f32 %v2551_v61 }
 0x4cb   : > { %v1841_v13 = vrot.slane %v1833_v8, %v5098_v32  ;;  %v1848_v14 = vrot.slane %v1834_v9, %v5098_v32  ;;  %v5332_v22 = vpop.eup %4583 }
 0x4cc   : > { %v2568_v19 = vsel %vm2504_vm2, %v5332_v22, 0.0  ;;  %v5336_v60 = vpop.eup %4585 }
 0x4cd   : > { %v1865_v42 = vcombine.low %v1841_v13, %v1857_v11  ;;  %v1866_v43 = vcombine.high %v1841_v13, %v1857_v11  ;;  %v1881_v44 = vcombine.low %v1848_v14, %v1864_v12  ;;  %v1882_v53 = vcombine.high %v1848_v14, %v1864_v12 }
 0x4ce   : > { %1823 = vrot.lane.b32.xlu1 %v5257_v49, %s4741_s26  ;;  %v2571_v23 = vsel %vm2504_vm2, %v5336_v60, 0.0 }
 0x4cf   : > { %v1873_v15 = vrot.slane %v1865_v42, %v5101_v39  ;;  %v1880_v16 = vrot.slane %v1866_v43, %v5101_v39  ;;  %v1889_v46 = vrot.slane %v1881_v44, %v5101_v39  ;;  %v1896_v17 = vrot.slane %v1882_v53, %v5101_v39 }
 0x4d1   : > { %v1969_v18 = vcombine.low %v1873_v15, %v1880_v16  ;;  %v4147_v20 = vcombine.high %v1873_v15, %v1880_v16  ;;  %v1985_v21 = vcombine.low %v1889_v46, %v1896_v17  ;;  %v4148_v24 = vcombine.high %v1889_v46, %v1896_v17 }
 0x4d3   : > { %v1976_v25 = vrot.slane %v1969_v18, %v5098_v32  ;;  %v1984_v26 = vrot.slane %v4147_v20, %v5098_v32  ;;  %v1992_v28 = vrot.slane %v1985_v21, %v5098_v32  ;;  %v2000_v29 = vrot.slane %v4148_v24, %v5098_v32  ;;  %v5344_v0 = vpop.eup %4587 }
 0x4d4   : > { %v2574_v2 = vsel %vm2504_vm2, %v5344_v0, 0.0 }
 0x4d5   : > { %v2001_v33 = vcombine.low %v1976_v25, %v1984_v26  ;;  %v2017_v34 = vcombine.low %v1992_v28, %v2000_v29  ;;  %v2002_v35 = vcombine.high %v1976_v25, %v1984_v26  ;;  %v2018_v36 = vcombine.high %v1992_v28, %v2000_v29 }
 0x4d7   : > { %v2009_v37 = vrot.slane %v2001_v33, %v5101_v39  ;;  %v2025_v38 = vrot.slane %v2017_v34, %v5101_v39  ;;  %v2016_v40 = vrot.slane %v2002_v35, %v5101_v39  ;;  %v2032_v45 = vrot.slane %v2018_v36, %v5101_v39 }
 0x4d9   : > { %v2033_v47 = vcombine.low %v2009_v37, %v2025_v38  ;;  %v2034_v48 = vcombine.high %v2009_v37, %v2025_v38  ;;  %v2035_v50 = vcombine.low %v2016_v40, %v2032_v45  ;;  %v2036_v51 = vcombine.high %v2016_v40, %v2032_v45 }
 0x4db   : > { %1817 = vrot.lane.b32.xlu0 %v5257_v49, %s4740_s24  ;;  %v2105_v55 = vpack.c.bf16 %v2033_v47, %v2033_v47  ;;  %v2106_v6 = vpack.c.bf16 %v2034_v48, %v2034_v48  ;;  %v2107_v11 = vpack.c.bf16 %v2035_v50, %v2035_v50  ;;  %v2108_v42 = vpack.c.bf16 %v2036_v51, %v2036_v51 }
 0x4dd   : > { %v2606_v54 = vsel %vm2604_vm3, %v2105_v55, 0  ;;  %v2652_v57 = vsel %vm2604_vm3, %v2106_v6, 0  ;;  %v2698_v27 = vsel %vm2604_vm3, %v2107_v11, 0  ;;  %v2744_v44 = vsel %vm2604_vm3, %v2108_v42, 0 }
 0x4de   : > { %4364 = vmatpush3.bf16.msra.mxu0 %v2606_v54  ;;  %4370 = vmatpush3.bf16.msra.mxu1 %v2652_v57 }
 0x4df   : > { %4375 = vmatprep.subr.bf16.mxu0 %v4737_v63  ;;  %4381 = vmatprep.subr.bf16.mxu1 %v4737_v63 }
 0x4f2   : > { %2569 = vadd.xlane.f32.xlu1 %v2568_v19 }
 0x4fa   : > { %2572 = vadd.xlane.f32.xlu0 %v2571_v23 }
 0x503   : > { %1829 = vrot.lane.b32.xlu1 %v5257_v49, %s4739_s13 }
 0x527   : > { %2575 = vadd.xlane.f32.xlu1 %v2574_v2 }
 0x53a   : > { %v2555_v4 = vpop.xlane.xlu1 %2554 }
 0x53b   : > { %4589 = vrcp.f32 %v2555_v4 }
 0x53e   : > { %v2567_v5 = vpop.xlane.xlu0 %2566 }
 0x542   : > { %v2558_v7 = vpop.xlane.xlu0 %2557 }
 0x543   : > { %4591 = vrcp.f32 %v2558_v7 }
 0x545   : > { %v4590_v8 = vpop.eup %4589 }
 0x546   : > { %v2585_v9 = vmul.f32 %v4590_v8, %v5282_v52 }
 0x548   : > { %v2593_v12 = vpack.c.bf16 %v2585_v9, %v2585_v9 }
 0x54a   : > { %4366 = vmatmul.mubr.msk.bf16.vlgmr.msra.gmra.mrb[12].mxu0 %vm2504_vm2, %v2593_v12  ;;  %v2561_v1 = vpop.xlane.xlu1 %2560 }
 0x54b   : > { %4376 = vmatpush3.bf16.msra.mxu0 %v2698_v27  ;;  %4593 = vrcp.f32 %v2561_v1  ;;  %4377 = vmatprep.mubr.msk.bf16.mxu0 %vm4738_vm0, %v4737_v63 }
 0x54c   : > { %4387 = vmatprep.subr.bf16.mxu0 %v4737_v63 }
 0x54d   : > { %v4592_v13 = vpop.eup %4591 }
 0x54e   : > { %v2586_v14 = vmul.f32 %v4592_v13, %v5290_v59  ;;  %v1824_v18 = vpop.permute.xlu1 %1823 }
 0x54f   : > { %v1902_v21 = vcombine.high %v5257_v49, %v1824_v18 }
 0x550   : > { %v2594_v52 = vpack.c.bf16 %v2586_v14, %v2586_v14 }
 0x552   : > { %v2564_v43 = vpop.xlane.xlu0 %2563  ;;  %4372 = vmatmul.mubr.msk.bf16.vlgmr.msra.gmra.mrb[28].mxu1 %vm2504_vm2, %v2594_v52 }
 0x553   : > { %4595 = vrcp.f32 %v2564_v43  ;;  %4382 = vmatpush3.bf16.msra.mxu1 %v2744_v44  ;;  %4383 = vmatprep.mubr.msk.bf16.mxu1 %vm4738_vm0, %v4737_v63 }
 0x554   : > { %4393 = vmatprep.subr.bf16.mxu1 %v4737_v63  ;;  %4597 = vrcp.f32 %v2567_v5 }
 0x555   : > { %v4594_v53 = vpop.eup %4593 }
 0x556   : > { %v2587_v15 = vmul.f32 %v4594_v53, %v5294_v41  ;;  %v1901_v41 = vcombine.low %v5257_v49, %v1824_v18  ;;  %v1818_v24 = vpop.permute.xlu0 %1817 }
 0x558   : > { %v2595_v16 = vpack.c.bf16 %v2587_v15, %v2587_v15  ;;  %v1909_v29 = vrot.slane %v1901_v41, %v5098_v32  ;;  %v5390_v15 = vld [vmem:[#allocation3] sm:$0xff] }
 0x55a   : > { %4378 = vmatmul.mubr.msk.bf16.vlgmr.msra.gmra.mrb[16].mxu0 %vm2504_vm2, %v2595_v16 }
 0x55b   : > { %4389 = vmatprep.mubr.msk.bf16.mxu0 %vm4738_vm0, %v4737_v63 }
 0x55d   : > { %v4596_v59 = vpop.eup %4595 }
 0x55e   : > { %v2588_v46 = vmul.f32 %v4596_v59, %v5298_v62  ;;  %v1916_v62 = vrot.slane %v1902_v21, %v5098_v32  ;;  %v4598_v23 = vpop.eup %4597 }
 0x55f   : > { %v2589_v12 = vmul.f32 %v4598_v23, %v5286_v10 }
 0x560   : > { %v2596_v17 = vpack.c.bf16 %v2588_v46, %v2588_v46 }
 0x561   : > { %v2597_v44 = vpack.c.bf16 %v2589_v12, %v2589_v12 }
 0x562   : > { %4384 = vmatmul.mubr.msk.bf16.vlgmr.msra.gmra.mrb[32].mxu1 %vm2504_vm2, %v2596_v17 }
 0x563   : > { %4395 = vmatprep.mubr.msk.bf16.mxu1 %vm4738_vm0, %v4737_v63 }
 0x57f   : > { %v2570_v20 = vpop.xlane.xlu1 %2569 }
 0x580   : > { %4599 = vrcp.f32 %v2570_v20 }
 0x583   : > { %v1830_v25 = vpop.permute.xlu1 %1829 }
 0x584   : > { %v1917_v26 = vcombine.low %v1818_v24, %v1830_v25  ;;  %v1918_v28 = vcombine.high %v1818_v24, %v1830_v25 }
 0x586   : > { %v1925_v33 = vrot.slane %v1917_v26, %v5098_v32  ;;  %v1932_v34 = vrot.slane %v1918_v28, %v5098_v32 }
 0x587   : > { %v2573_v57 = vpop.xlane.xlu0 %2572 }
 0x588   : > { %v1933_v63 = vcombine.low %v1909_v29, %v1925_v33  ;;  %v1934_v35 = vcombine.high %v1909_v29, %v1925_v33  ;;  %v1949_v36 = vcombine.low %v1916_v62, %v1932_v34  ;;  %v1950_v37 = vcombine.high %v1916_v62, %v1932_v34 }
 0x589   : > { %4601 = vrcp.f32 %v2573_v57 }
 0x58a   : > { %v1941_v49 = vrot.slane %v1933_v63, %v5101_v39  ;;  %v1948_v38 = vrot.slane %v1934_v35, %v5101_v39  ;;  %v1957_v40 = vrot.slane %v1949_v36, %v5101_v39  ;;  %v1964_v45 = vrot.slane %v1950_v37, %v5101_v39  ;;  %v4600_v5 = vpop.eup %4599  ;;  %v4565_v37 = vld [vmem:[%s5660_s21] sm:$0xff]  }
 0x58b   : > { %v2590_v27 = vmul.f32 %v4600_v5, %v5332_v22 }
 0x58c   : > { %v2037_v47 = vcombine.low %v1941_v49, %v1948_v38  ;;  %v4149_v48 = vcombine.high %v1941_v49, %v1948_v38  ;;  %v2053_v50 = vcombine.low %v1957_v40, %v1964_v45  ;;  %v4150_v51 = vcombine.high %v1957_v40, %v1964_v45  ;;  %v4566_v49 = vld [vmem:[%s5660_s21 + $0x8] sm:$0xff]  }
 0x58d   : > { %v2598_v53 = vpack.c.bf16 %v2590_v27, %v2590_v27 }
 0x58e   : > { %v2044_v55 = vrot.slane %v2037_v47, %v5098_v32  ;;  %v2052_v6 = vrot.slane %v4149_v48, %v5098_v32  ;;  %v2060_v56 = vrot.slane %v2053_v50, %v5098_v32  ;;  %v2068_v54 = vrot.slane %v4150_v51, %v5098_v32  ;;  %v4567_v48 = vld [vmem:[%s5660_s21 + $0x10] sm:$0xff]  }
 0x590   : > { %v2069_v58 = vcombine.low %v2044_v55, %v2052_v6  ;;  %v2085_v30 = vcombine.low %v2060_v56, %v2068_v54  ;;  %v2070_v31 = vcombine.high %v2044_v55, %v2052_v6  ;;  %v2086_v19 = vcombine.high %v2060_v56, %v2068_v54 }
 0x592   : > { %v2077_v3 = vrot.slane %v2069_v58, %v5101_v39  ;;  %v2093_v61 = vrot.slane %v2085_v30, %v5101_v39  ;;  %v2084_v2 = vrot.slane %v2070_v31, %v5101_v39  ;;  %v2100_v4 = vrot.slane %v2086_v19, %v5101_v39  ;;  %v4568_v19 = vld [vmem:[%s5660_s21 + $0x18] sm:$0xff]  }
 0x593   : > { %v4602_v10 = vpop.eup %4601 }
 0x594   : > { %v2101_v7 = vcombine.low %v2077_v3, %v2093_v61  ;;  %v2102_v8 = vcombine.high %v2077_v3, %v2093_v61  ;;  %v2103_v9 = vcombine.low %v2084_v2, %v2100_v4  ;;  %v2104_v11 = vcombine.high %v2084_v2, %v2100_v4 }
 0x595   : > { %v2591_v59 = vmul.f32 %v4602_v10, %v5336_v60 }
 0x596   : > { %v2109_v1 = vpack.c.bf16 %v2101_v7, %v2101_v7  ;;  %v2110_v13 = vpack.c.bf16 %v2102_v8, %v2102_v8  ;;  %v2111_v43 = vpack.c.bf16 %v2103_v9, %v2103_v9  ;;  %v2112_v52 = vpack.c.bf16 %v2104_v11, %v2104_v11  ;;  %v4569_v9 = vld [vmem:[%s5660_s21 + $0x20] sm:$0xff]  }
 0x597   : > { %v2599_v46 = vpack.c.bf16 %v2591_v59, %v2591_v59 }
 0x598   : > { %v2790_v14 = vsel %vm2604_vm3, %v2109_v1, 0  ;;  %v2836_v42 = vsel %vm2604_vm3, %v2110_v13, 0  ;;  %v2882_v22 = vsel %vm2604_vm3, %v2111_v43, 0  ;;  %v2928_v16 = vsel %vm2604_vm3, %v2112_v52, 0  ;;  %v4570_v52 = vld [vmem:[%s5660_s21 + $0x28] sm:$0xff]  }
 0x599   : > { %4388 = vmatpush3.bf16.msra.mxu0 %v2790_v14  ;;  %4394 = vmatpush3.bf16.msra.mxu1 %v2836_v42 }
 0x59a   : > { %4399 = vmatprep.subr.bf16.mxu0 %v5390_v15  ;;  %4405 = vmatprep.subr.bf16.mxu1 %v5390_v15 }
 0x59c   : > { %4390 = vmatmul.mubr.msk.bf16.vlgmr.msra.gmra.mrb[20].mxu0 %vm2504_vm2, %v2597_v44  ;;  %4396 = vmatmul.mubr.msk.bf16.vlgmr.msra.gmra.mrb[36].mxu1 %vm2504_vm2, %v2598_v53 }
 0x59d   : > { %4400 = vmatpush3.bf16.msra.mxu0 %v2882_v22  ;;  %4406 = vmatpush3.bf16.msra.mxu1 %v2928_v16 }
 0x59e   : > { %4401 = vmatprep.mubr.msk.bf16.mxu0 %vm4738_vm0, %v5390_v15  ;;  %4407 = vmatprep.mubr.msk.bf16.mxu1 %vm4738_vm0, %v5390_v15 }
 0x59f   : > { %4411 = vmatprep.subr.bf16.mxu0 %v5390_v15 }
 0x5a4   : > { %4402 = vmatmul.mubr.msk.bf16.vlgmr.msra.gmra.mrb[24].mxu0 %vm2504_vm2, %v2599_v46 }
 0x5a5   : > { %4427 = vmatprep.mubr.msk.bf16.mxu0 %vm4738_vm0, %v5390_v15  ;;  %4412 = vmatpush3.bf16.msra.mxu0 %v4565_v37 }
 0x5a6   : > { %4413 = vmatprep.subr.bf16.mxu0 %v5390_v15 }
 0x5a9   : > { %4414 = vmatpush3.bf16.msra.mxu0 %v4566_v49 }
 0x5aa   : > { %4415 = vmatprep.subr.bf16.mxu0 %v5390_v15 }
 0x5ad   : > { %4416 = vmatpush3.bf16.msra.mxu0 %v4567_v48 }
 0x5ae   : > { %4417 = vmatprep.subr.bf16.mxu0 %v5390_v15 }
 0x5b1   : > { %4418 = vmatpush3.bf16.msra.mxu0 %v4568_v19 }
 0x5b2   : > { %4419 = vmatprep.subr.bf16.mxu0 %v5390_v15 }
 0x5b4   : > { %v2576_v17 = vpop.xlane.xlu1 %2575 }
 0x5b5   : > { %4603 = vrcp.f32 %v2576_v17  ;;  %4420 = vmatpush3.bf16.msra.mxu0 %v4569_v9 }
 0x5b6   : > { %4421 = vmatprep.subr.bf16.mxu0 %v5390_v15 }
 0x5b9   : > { %4422 = vmatpush3.bf16.msra.mxu0 %v4570_v52 }
 0x5ba   : > { %4423 = vmatprep.subr.bf16.mxu0 %v5390_v15 }
 0x5bf   : > { %v4604_v18 = vpop.eup %4603 }
 0x5c0   : > { %v2592_v20 = vmul.f32 %v4604_v18, %v5344_v0 }
 0x5c2   : > { %v2600_v60 = vpack.c.bf16 %v2592_v20, %v2592_v20 }
 0x5c4   : > { %4408 = vmatmul.mubr.msk.bf16.vlgmr.msra.gmra.mrb[40].mxu1 %vm2504_vm2, %v2600_v60 }
 0x61d   : > { %v2642_v41 = vpop.f32.mrb[12].mxu0 }
 0x61e   : > { %v4367_v21 = vpop.f32.mrb[13].mxu0 }
 0x61f   : > { %v2645_v24 = vpop.f32.mrb[14].mxu0 }
 0x620   : > { %v4368_v25 = vpop.f32.mrb[15].mxu0 }
 0x625   : > { %v2688_v26 = vpop.f32.mrb[28].mxu1 }
 0x626   : > { %v4373_v28 = vpop.f32.mrb[29].mxu1 }
 0x627   : > { %v2691_v29 = vpop.f32.mrb[30].mxu1 }
 0x628   : > { %v4374_v62 = vpop.f32.mrb[31].mxu1 }
 0x62d   : > { %v2734_v33 = vpop.f32.mrb[16].mxu0 }
 0x62e   : > { %v2970_v34 = vcombine.low %v2642_v41, %v2734_v33  ;;  %v2971_v63 = vcombine.high %v2642_v41, %v2734_v33  ;;  %v4379_v35 = vpop.f32.mrb[17].mxu0 }
 0x62f   : > { %v2737_v36 = vpop.f32.mrb[18].mxu0 }
 0x630   : > { %v4380_v0 = vpop.f32.mrb[19].mxu0  ;;  %v2978_v51 = vrot.slane %v2970_v34, %v5098_v32  ;;  %v2985_v55 = vrot.slane %v2971_v63, %v5098_v32 }
 0x635   : > { %v2780_v38 = vpop.f32.mrb[32].mxu1 }
 0x636   : > { %v2986_v40 = vcombine.low %v2688_v26, %v2780_v38  ;;  %v2987_v45 = vcombine.high %v2688_v26, %v2780_v38  ;;  %v4385_v47 = vpop.f32.mrb[33].mxu1 }
 0x637   : > { %v2783_v50 = vpop.f32.mrb[34].mxu1 }
 0x638   : > { %v2994_v6 = vrot.slane %v2986_v40, %v5098_v32  ;;  %v3001_v56 = vrot.slane %v2987_v45, %v5098_v32  ;;  %v4386_v54 = vpop.f32.mrb[35].mxu1 }
 0x63a   : > { %v3002_v57 = vcombine.low %v2978_v51, %v2994_v6  ;;  %v3003_v58 = vcombine.high %v2978_v51, %v2994_v6  ;;  %v3018_v30 = vcombine.low %v2985_v55, %v3001_v56  ;;  %v3019_v31 = vcombine.high %v2985_v55, %v3001_v56 }
 0x63c   : > { %v3010_v23 = vrot.slane %v3002_v57, %v5101_v39  ;;  %v3017_v3 = vrot.slane %v3003_v58, %v5101_v39  ;;  %v3026_v61 = vrot.slane %v3018_v30, %v5101_v39  ;;  %v3033_v2 = vrot.slane %v3019_v31, %v5101_v39 }
 0x63e   : > { %v3106_v4 = vcombine.low %v3010_v23, %v3017_v3  ;;  %v4169_v5 = vcombine.high %v3010_v23, %v3017_v3  ;;  %v3122_v7 = vcombine.low %v3026_v61, %v3033_v2  ;;  %v4170_v8 = vcombine.high %v3026_v61, %v3033_v2  ;;  %v4571_v3 = vld [vmem:[%s5660_s21 + $0x30] sm:$0xff]  }
 0x63f   : > { %4424 = vmatpush3.bf16.msra.mxu0 %v4571_v3 }
 0x640   : > { %v3113_v11 = vrot.slane %v3106_v4, %v5098_v32  ;;  %v3121_v12 = vrot.slane %v4169_v5, %v5098_v32  ;;  %v3129_v27 = vrot.slane %v3122_v7, %v5098_v32  ;;  %v3137_v1 = vrot.slane %v4170_v8, %v5098_v32  ;;  %4425 = vmatprep.subr.bf16.mxu0 %v5390_v15 }
 0x642   : > { %v3139_v13 = vcombine.high %v3113_v11, %v3121_v12  ;;  %v3155_v14 = vcombine.high %v3129_v27, %v3137_v1  ;;  %v3138_v42 = vcombine.low %v3113_v11, %v3121_v12  ;;  %v3154_v43 = vcombine.low %v3129_v27, %v3137_v1 }
 0x644   : > { %v5433_v44 = vrot.slane %v3139_v13, %v5101_v39  ;;  %v5436_v53 = vrot.slane %v3155_v14, %v5101_v39  ;;  %v5439_v10 = vrot.slane %v3138_v42, %v5101_v39  ;;  %v5442_v22 = vrot.slane %v3154_v43, %v5101_v39  ;;  %v4572_v14 = vld [vmem:[%s5660_s21 + $0x38] sm:$0xff]  }
 0x645   : > { %4426 = vmatpush3.bf16.msra.mxu0 %v4572_v14 }
 0x646   : > { %v3172_v16 = vcombine.low %v5433_v44, %v5436_v53  ;;  %v3170_v59 = vcombine.low %v5439_v10, %v5442_v22  ;;  %v3171_v46 = vcombine.high %v5439_v10, %v5442_v22  ;;  %v3173_v17 = vcombine.high %v5433_v44, %v5436_v53  ;;  %v4173_v10 = vld [vmem:[%s5662_s27] ss:$0 sm:$0xff] }
 0x66f   : > { %v2826_v18 = vpop.f32.mrb[20].mxu0  ;;  %v2872_v20 = vpop.f32.mrb[36].mxu1 }
 0x670   : > { %v4391_v60 = vpop.f32.mrb[21].mxu0  ;;  %v4397_v41 = vpop.f32.mrb[37].mxu1 }
 0x671   : > { %v2829_v21 = vpop.f32.mrb[22].mxu0  ;;  %v2875_v24 = vpop.f32.mrb[38].mxu1 }
 0x672   : > { %v4392_v25 = vpop.f32.mrb[23].mxu0  ;;  %v4398_v26 = vpop.f32.mrb[39].mxu1 }
 0x677   : > { %v2918_v28 = vpop.f32.mrb[24].mxu0 }
 0x678   : > { %v3038_v29 = vcombine.low %v2826_v18, %v2918_v28  ;;  %v3039_v62 = vcombine.high %v2826_v18, %v2918_v28  ;;  %v4403_v33 = vpop.f32.mrb[25].mxu0 }
 0x679   : > { %v2921_v34 = vpop.f32.mrb[26].mxu0 }
 0x67a   : > { %v4404_v63 = vpop.f32.mrb[27].mxu0  ;;  %v3046_v38 = vrot.slane %v3038_v29, %v5098_v32  ;;  %v3053_v40 = vrot.slane %v3039_v62, %v5098_v32 }
 0x697   : > { %v2964_v35 = vpop.f32.mrb[40].mxu1 }
 0x698   : > { %v3054_v36 = vcombine.low %v2872_v20, %v2964_v35  ;;  %v3055_v0 = vcombine.high %v2872_v20, %v2964_v35  ;;  %v4409_v37 = vpop.f32.mrb[41].mxu1 }
 0x699   : > { %v2967_v49 = vpop.f32.mrb[42].mxu1 }
 0x69a   : > { %v3062_v45 = vrot.slane %v3054_v36, %v5098_v32  ;;  %v3069_v47 = vrot.slane %v3055_v0, %v5098_v32  ;;  %v4410_v48 = vpop.f32.mrb[43].mxu1  ;;  %v4610_v0 = vld [vmem:[%s5005_s0] sm:$0xff]  ;;  %v4611_v49 = vld [vmem:[%s5005_s0 + $0x8] sm:$0xff] }
 0x69c   : > { %v3070_v50 = vcombine.low %v3046_v38, %v3062_v45  ;;  %v3071_v51 = vcombine.high %v3046_v38, %v3062_v45  ;;  %v3086_v55 = vcombine.low %v3053_v40, %v3069_v47  ;;  %v3087_v6 = vcombine.high %v3053_v40, %v3069_v47 }
 0x69e   : > { %v3078_v56 = vrot.slane %v3070_v50, %v5101_v39  ;;  %v3085_v54 = vrot.slane %v3071_v51, %v5101_v39  ;;  %v3094_v57 = vrot.slane %v3086_v55, %v5101_v39  ;;  %v3101_v58 = vrot.slane %v3087_v6, %v5101_v39 }
 0x6a0   : > { %v3174_v30 = vcombine.low %v3078_v56, %v3085_v54  ;;  %v4171_v31 = vcombine.high %v3078_v56, %v3085_v54  ;;  %v3190_v19 = vcombine.low %v3094_v57, %v3101_v58  ;;  %v4172_v23 = vcombine.high %v3094_v57, %v3101_v58 }
 0x6a2   : > { %v3181_v61 = vrot.slane %v3174_v30, %v5098_v32  ;;  %v3189_v2 = vrot.slane %v4171_v31, %v5098_v32  ;;  %v3197_v4 = vrot.slane %v3190_v19, %v5098_v32  ;;  %v3205_v5 = vrot.slane %v4172_v23, %v5098_v32  ;;  %v4182_v23 = vld [vmem:[%s5664_s30] ss:$0 sm:$0xff] }
 0x6a4   : > { %v3207_v7 = vcombine.high %v3181_v61, %v3189_v2  ;;  %v3223_v8 = vcombine.high %v3197_v4, %v3205_v5  ;;  %v3206_v9 = vcombine.low %v3181_v61, %v3189_v2  ;;  %v3222_v11 = vcombine.low %v3197_v4, %v3205_v5  ;;  %v4183_v2 = vld [vmem:[%s5666_s5] ss:$0 sm:$0xff] }
 0x6a6   : > { %v3221_v12 = vrot.slane %v3207_v7, %v5101_v39  ;;  %v3237_v27 = vrot.slane %v3223_v8, %v5101_v39  ;;  %v3214_v1 = vrot.slane %v3206_v9, %v5101_v39  ;;  %v3230_v13 = vrot.slane %v3222_v11, %v5101_v39 }
 0x6a8   : > { %v3240_v42 = vcombine.low %v3221_v12, %v3237_v27  ;;  %v3239_v43 = vcombine.high %v3214_v1, %v3230_v13  ;;  %v3238_v52 = vcombine.low %v3214_v1, %v3230_v13  ;;  %v3241_v32 = vcombine.high %v3221_v12, %v3237_v27 }
 0x6aa   : > { %v4523_v18 = vpack.i.bf16 %v3240_v42, %v3172_v16  ;;  %v4518_v20 = vpack.i.bf16 %v3239_v43, %v3171_v46  ;;  %v4528_v15 = vpack.i.bf16 %v3241_v32, %v3173_v17 }
 0x6ac   : > { %4524 = vrot.lane.b32.xlu1 %v4523_v18, %s4741_s26  ;;  %4519 = vrot.lane.b32.xlu0 %v4518_v20, %s4739_s13 }
 0x6b0   : > { %4529 = vrot.lane.b32.xlu0 %v4528_v15, %s4740_s24 }
 0x71e   : > { %v4525_v60 = vpop.permute.xlu1 %4524  ;;  %v4520_v39 = vpop.permute.xlu0 %4519 }
 0x71f   : > { %v4522_v41 = vunpack.i.h.bf16 %v4520_v39  ;;  %v4521_v21 = vunpack.i.l.bf16 %v4520_v39  ;;  %v4527_v24 = vunpack.i.h.bf16 %v4525_v60  ;;  %v4526_v25 = vunpack.i.l.bf16 %v4525_v60 }
 0x721   : > { %v3266_v44 = vsel %vm2113_vm1, %v3170_v59, %v4521_v21  ;;  %v3267_v53 = vsel %vm2113_vm1, %v3238_v52, %v4522_v41 }
 0x722   : > { %v4530_v16 = vpop.permute.xlu0 %4529  ;;  %v3269_v26 = vsel %vm3268_vm4, %v3266_v44, %v4526_v25  ;;  %v3270_v28 = vsel %vm3268_vm4, %v3267_v53, %v4527_v24 }
 0x723   : > { %v4532_v46 = vunpack.i.h.bf16 %v4530_v16  ;;  %v4531_v17 = vunpack.i.l.bf16 %v4530_v16 }
 0x725   : > { %v3272_v29 = vsel %vm3271_vm5, %v3269_v26, %v4531_v17  ;;  %v3273_v62 = vsel %vm3271_vm5, %v3270_v28, %v4532_v46 }
 0x726   : > { %v3274_v33 = vpack.c.bf16 %v3273_v62, %v3272_v29 }
 0x728   : > { %4428 = vmatmul.mubr.bf16.vlgmr.msra.gmra.mrb[28].mxu0 %v3274_v33 }
 0x7fb   : > { %v3380_v22 = vpop.f32.mrb[28].mxu0 }
 0x7fc   : > { %v3381_v59 = vadd.f32 %v4173_v10, %v3380_v22  ;;  %v4429_v34 = vpop.f32.mrb[29].mxu0 }
 0x7fd   : > { %v3383_v63 = vpop.f32.mrb[30].mxu0 }
 0x7fe   : > { %v3384_v35 = vadd.f32 %v4173_v10, %v3383_v63  ;;  %v4430_v36 = vpop.f32.mrb[31].mxu0  ;;  %v3387_v37 = vadd.f32 %v4610_v0, %v3381_v59 }
 0x800   : > { %3391 = vadd.xlane.f32.xlu1 %v3387_v37  ;;  %v3388_v38 = vadd.f32 %v4611_v49, %v3384_v35 }
 0x802   : > { %3393 = vadd.xlane.f32.xlu0 %v3388_v38 }
 0x88d   : > { %v3392_v40 = vpop.xlane.xlu1 %3391 }
 0x88e   : > { %v3396_v45 = vmul.f32 0.0078125, %v3392_v40 }
 0x88f   : > { %v3394_v47 = vpop.xlane.xlu0 %3393 }
 0x890   : > { %v3398_v48 = vsub.f32 %v3387_v37, %v3396_v45  ;;  %v3397_v50 = vmul.f32 0.0078125, %v3394_v47 }
 0x892   : > { %v3399_v51 = vsub.f32 %v3388_v38, %v3397_v50  ;;  %v3400_v55 = vmul.f32 %v3398_v48, %v3398_v48 }
 0x894   : > { %3402 = vadd.xlane.f32.xlu0 %v3400_v55  ;;  %v3401_v6 = vmul.f32 %v3399_v51, %v3399_v51 }
 0x896   : > { %3404 = vadd.xlane.f32.xlu1 %v3401_v6 }
 0x921   : > { %v3403_v56 = vpop.xlane.xlu0 %3402 }
 0x922   : > { %v3406_v54 = vmul.f32 0.0078125, %v3403_v56 }
 0x923   : > { %v3405_v57 = vpop.xlane.xlu1 %3404 }
 0x924   : > { %v3408_v58 = vadd.f32 1e-12, %v3406_v54  ;;  %v3407_v30 = vmul.f32 0.0078125, %v3405_v57 }
 0x926   : > { %4605 = vrsqrt.f32 %v3408_v58  ;;  %v3409_v31 = vadd.f32 1e-12, %v3407_v30 }
 0x928   : > { %4607 = vrsqrt.f32 %v3409_v31 }
 0x930   : > { %v4606_v19 = vpop.eup %4605 }
 0x931   : > { %v3412_v3 = vmul.f32 %v4606_v19, %v3398_v48 }
 0x932   : > { %v4608_v61 = vpop.eup %4607 }
 0x933   : > { %v3420_v4 = vmul.f32 %v4182_v23, %v3412_v3  ;;  %v3413_v5 = vmul.f32 %v4608_v61, %v3399_v51 }
 0x935   : > { %v3428_v7 = vadd.f32 %v4183_v2, %v3420_v4  ;;  %v3421_v8 = vmul.f32 %v4182_v23, %v3413_v5 }
 0x937   : > { %3430 = vst [vmem:[#allocation2] sm:$0xff] %v3428_v7  ;;  %v3429_v9 = vadd.f32 %v4183_v2, %v3421_v8 }
 0x939   : > { %3431 = vst [vmem:[#allocation2 + $0x8] sm:$0xff] %v3429_v9 }
 0x93a PF: > { %v4612_v11 = vld [vmem:[%s5008_s17 + $0x4] ss:$8 sps:$4 sm:$0xff]   ;;  %v4614_v12 = vld [vmem:[%s5008_s17] ss:$8 sps:$4 sm:$0xff]   ;;  %v4744_v27 = vmov 0   ;;  %v4640_v26 = vld [vmem:[%s5000_s4 + $0x50] sm:$0xff]   ;;  %v3455_v0 = vlaneseq }
 0x93b   : > { %3577 = vmatprep.mubr.bf16.mxu0 %v4744_v27  ;;  %3545 = vmatprep.subr.bf16.mxu0 %v4612_v11  ;;  %v4615_v1 = vld [vmem:[%s5008_s17 + $0x14] ss:$8 sps:$4 sm:$0xff]   ;;  %v4617_v13 = vld [vmem:[%s5008_s17 + $0x10] ss:$8 sps:$4 sm:$0xff]   ;;  %v4618_v14 = vld [vmem:[%s5008_s17 + $0x24] ss:$8 sps:$4 sm:$0xff]  }
 0x93c   : > { %3546 = vmatpush1.bf16.msra.mxu0 %v4614_v12  ;;  %v4620_v42 = vld [vmem:[%s5008_s17 + $0x20] ss:$8 sps:$4 sm:$0xff]   ;;  %v4621_v43 = vld [vmem:[%s5008_s17 + $0x34] ss:$8 sps:$4 sm:$0xff]   ;;  %v4623_v52 = vld [vmem:[%s5008_s17 + $0x30] ss:$8 sps:$4 sm:$0xff]  }
 0x93d   : > { %3547 = vmatprep.subr.bf16.mxu0 %v4615_v1  ;;  %v4624_v32 = vld [vmem:[%s5008_s17 + $0x44] ss:$8 sps:$4 sm:$0xff]   ;;  %v4626_v18 = vld [vmem:[%s5008_s17 + $0x40] ss:$8 sps:$4 sm:$0xff]   ;;  %v4627_v20 = vld [vmem:[%s5008_s17 + $0x54] ss:$8 sps:$4 sm:$0xff]  }
 0x93e   : > { %v4629_v15 = vld [vmem:[%s5008_s17 + $0x50] ss:$8 sps:$4 sm:$0xff]   ;;  %v4630_v60 = vld [vmem:[%s5008_s17 + $0x64] ss:$8 sps:$4 sm:$0xff]   ;;  %v4632_v39 = vld [vmem:[%s5008_s17 + $0x60] ss:$8 sps:$4 sm:$0xff]  }
 0x93f   : > { %v4633_v41 = vld [vmem:[%s5008_s17 + $0x74] ss:$8 sps:$4 sm:$0xff]   ;;  %v4635_v21 = vld [vmem:[%s5008_s17 + $0x70] ss:$8 sps:$4 sm:$0xff]   ;;  %v5516_v24 = vld [vmem:[#allocation2] sm:$0xff]  ;;  %v3456_v37 = vshrl.u32 %v3455_v0, 7 }
 0x940   : > { %3548 = vmatpush1.bf16.msra.mxu0 %v4617_v13  ;;  %v5518_v25 = vld [vmem:[#allocation2 + $0x8] sm:$0xff]  ;;  %v4636_v53 = vld [vmem:[%s5000_s4 + $0x40] sm:$0xff]   ;;  %v4641_v28 = vld [vmem:[%s5000_s4 + $0x10] sm:$0xff]   ;;  %p4216_p3 = scmp.ne.s32.totalorder %s4710_s23, 1 }
 0x941   : > { %3549 = vmatprep.subr.bf16.mxu0 %v4618_v14  ;;  %v3436_v44 = vpack.c.bf16 %v5518_v25, %v5516_v24  ;;  %v4637_v16 = vld [vmem:[%s5000_s4] sm:$0xff]   ;;  %4273 = vmatprep.subr.bf16.mxu1 %v4636_v53  ;;  %v4638_v46 = vld [vmem:[%s5000_s4 + $0x48] sm:$0xff]   ;;  %v4642_v29 = vld [vmem:[%s5000_s4 + $0x58] sm:$0xff]   ;;  %v3457_v49 = vsub.s32 0, %v3456_v37  ;;  %v3461_v40 = vsub.s32 1, %v3456_v37  ;;  %s5670_s10 = scalar_lea.vmem (!%p4216_p3), %s5604_s14, %s4932_s16 }
 0x942   : > { %4274 = vmatpush3.bf16.msra.mxu1 %v4637_v16  ;;  %v4639_v17 = vld [vmem:[%s5000_s4 + $0x8] sm:$0xff]   ;;  %v4643_v62 = vld [vmem:[%s5000_s4 + $0x18] sm:$0xff]   ;;  %v4644_v33 = vld [vmem:[%s5000_s4 + $0x60] sm:$0xff]  }
 0x943   : > { %4275 = vmatprep.subr.bf16.mxu1 %v4638_v46  ;;  %v4645_v10 = vld [vmem:[%s5000_s4 + $0x20] sm:$0xff]   ;;  %v4646_v22 = vld [vmem:[%s5000_s4 + $0x68] sm:$0xff]   ;;  %v4648_v34 = vld [vmem:[%s5000_s4 + $0x70] sm:$0xff]  }
 0x944   : > { %3550 = vmatpush1.bf16.msra.mxu0 %v4620_v42  ;;  %v4647_v59 = vld [vmem:[%s5000_s4 + $0x28] sm:$0xff]   ;;  %v4649_v63 = vld [vmem:[%s5000_s4 + $0x30] sm:$0xff]   ;;  %v4650_v35 = vld [vmem:[%s5000_s4 + $0x78] sm:$0xff]  }
 0x945   : > { %3551 = vmatprep.subr.bf16.mxu0 %v4621_v43  ;;  %v4651_v36 = vld [vmem:[%s5000_s4 + $0x38] sm:$0xff]   ;;  %v3453_v38 = vld [vmem:[%s866_s1] sm:$0x3]  ;;  %s5668_s4 = sld [smem:[#allocation29_spill]] (!%p4216_p3) }
 0x946   : > { %4276 = vmatpush3.bf16.msra.mxu1 %v4639_v17  ;;  %v3458_v45 = vrot.slane %v3453_v38, %v3457_v49  ;;  %v3462_v47 = vrot.slane %v3453_v38, %v3461_v40 }
 0x947   : > { %4277 = vmatprep.subr.bf16.mxu1 %v4640_v26 }
 0x948   : > { %3552 = vmatpush1.bf16.msra.mxu0 %v4623_v52 }
 0x949   : > { %3553 = vmatprep.subr.bf16.mxu0 %v4624_v32 }
 0x94a   : > { %4278 = vmatpush3.bf16.msra.mxu1 %v4641_v28 }
 0x94b   : > { %4279 = vmatprep.subr.bf16.mxu1 %v4642_v29  ;;  %s5669_s8 = scalar_lea.vmem (!%p4216_p3), %s5668_s4, %s4932_s16 }
 0x94c   : > { %3554 = vmatpush1.bf16.msra.mxu0 %v4626_v18  ;;  %v4217_v49 = vld [vmem:[%s5669_s8] ss:$0 sm:$0xff] (!%p4216_p3) }
 0x94d   : > { %3555 = vmatprep.subr.bf16.mxu0 %v4627_v20 }
 0x94e   : > { %4280 = vmatpush3.bf16.msra.mxu1 %v4643_v62 }
 0x94f   : > { %4281 = vmatprep.subr.bf16.mxu1 %v4644_v33  ;;  %v3624_v33 = vld [vmem:[#allocation3] sm:$0xff] }
 0x950   : > { %3556 = vmatpush1.bf16.msra.mxu0 %v4629_v15 }
 0x951   : > { %3557 = vmatprep.subr.bf16.mxu0 %v4630_v60 }
 0x952   : > { %4282 = vmatpush3.bf16.msra.mxu1 %v4645_v10 }
 0x953   : > { %4283 = vmatprep.subr.bf16.mxu1 %v4646_v22 }
 0x954   : > { %3558 = vmatpush1.bf16.msra.mxu0 %v4632_v39 }
 0x955   : > { %3559 = vmatprep.subr.bf16.mxu0 %v4633_v41 }
 0x956   : > { %4284 = vmatpush3.bf16.msra.mxu1 %v4647_v59 }
 0x957   : > { %4285 = vmatprep.subr.bf16.mxu1 %v4648_v34  ;;  %v3625_v34 = vld [vmem:[#allocation3 + $0x8] sm:$0xff] }
 0x958   : > { %3560 = vmatpush1.bf16.msra.mxu0 %v4635_v21 }
 0x95a   : > { %4286 = vmatpush3.bf16.msra.mxu1 %v4649_v63 }
 0x95b   : > { %3578 = vmatmul.mubr.bf16.vlgmr.msra.gmra.mrb[0].mxu0 %v3436_v44  ;;  %4287 = vmatprep.subr.bf16.mxu1 %v4650_v35 }
 0x95e   : > { %4288 = vmatpush3.bf16.msra.mxu1 %v4651_v36 }
 0xa2e   : > { %v3579_v48 = vpop.f32.mrb[0].mxu0 }
 0xa2f   : > { %v3580_v50 = vadd.f32 %v3579_v48, %v3458_v45  ;;  %v3581_v51 = vpop.f32.mrb[1].mxu0 }
 0xa30   : > { %v3582_v55 = vadd.f32 %v3581_v51, %v3462_v47  ;;  %v3583_v6 = vpop.f32.mrb[2].mxu0 }
 0xa31   : > { %v3592_v56 = vmul.f32 0.044715, %v3580_v50  ;;  %v3584_v54 = vadd.f32 %v3583_v6, %v3458_v45  ;;  %v3585_v57 = vpop.f32.mrb[3].mxu0  ;;  %v3588_v60 = vmul.f32 0.5, %v3580_v50 }
 0xa32   : > { %v3593_v58 = vmul.f32 0.044715, %v3582_v55  ;;  %v3586_v30 = vadd.f32 %v3585_v57, %v3462_v47  ;;  %v3589_v21 = vmul.f32 0.5, %v3582_v55 }
 0xa33   : > { %v3596_v31 = vmul.f32 %v3592_v56, %v3580_v50  ;;  %v3594_v19 = vmul.f32 0.044715, %v3584_v54  ;;  %v3590_v39 = vmul.f32 0.5, %v3584_v54 }
 0xa34   : > { %v3595_v23 = vmul.f32 0.044715, %v3586_v30  ;;  %v3597_v3 = vmul.f32 %v3593_v58, %v3582_v55  ;;  %v3591_v44 = vmul.f32 0.5, %v3586_v30 }
 0xa35   : > { %v3600_v61 = vmul.f32 %v3596_v31, %v3580_v50  ;;  %v3598_v2 = vmul.f32 %v3594_v19, %v3584_v54 }
 0xa36   : > { %v3599_v4 = vmul.f32 %v3595_v23, %v3586_v30  ;;  %v3601_v5 = vmul.f32 %v3597_v3, %v3582_v55 }
 0xa37   : > { %v3602_v7 = vmul.f32 %v3598_v2, %v3584_v54  ;;  %v3604_v8 = vadd.f32 %v3600_v61, %v3580_v50  ;;  %v4218_v61 = vld [vmem:[%s5670_s10] ss:$0 sm:$0xff] (!%p4216_p3) }
 0xa38   : > { %v3603_v9 = vmul.f32 %v3599_v4, %v3586_v30  ;;  %v3605_v11 = vadd.f32 %v3601_v5, %v3582_v55  ;;  %v4219_v4 = vld [vmem:[%s886_s11] ss:$0 sm:$0xff] (!%p4216_p3) }
 0xa39   : > { %v3606_v12 = vadd.f32 %v3602_v7, %v3584_v54  ;;  %v3608_v27 = vmul.f32 0.7978846, %v3604_v8 }
 0xa3a   : > { %v3607_v1 = vadd.f32 %v3603_v9, %v3586_v30  ;;  %v3609_v13 = vmul.f32 0.7978846, %v3605_v11 }
 0xa3b   : > { %v3610_v14 = vmul.f32 0.7978846, %v3606_v12  ;;  %4652 = vtanh.f32 %v3608_v27 }
 0xa3c   : > { %v3611_v42 = vmul.f32 0.7978846, %v3607_v1  ;;  %4654 = vtanh.f32 %v3609_v13 }
 0xa3d   : > { %4656 = vtanh.f32 %v3610_v14 }
 0xa3e   : > { %4658 = vtanh.f32 %v3611_v42 }
 0xa45   : > { %v4653_v43 = vpop.eup %4652 }
 0xa46   : > { %v4655_v52 = vpop.eup %4654  ;;  %v3616_v32 = vadd.f32 1.0, %v4653_v43 }
 0xa47   : > { %v4657_v18 = vpop.eup %4656  ;;  %v3617_v20 = vadd.f32 1.0, %v4655_v52 }
 0xa48   : > { %v4659_v15 = vpop.eup %4658  ;;  %v3618_v41 = vadd.f32 1.0, %v4657_v18  ;;  %v3620_v16 = vmul.f32 %v3616_v32, %v3588_v60 }
 0xa49   : > { %v3619_v53 = vadd.f32 1.0, %v4659_v15  ;;  %v3621_v17 = vmul.f32 %v3617_v20, %v3589_v21 }
 0xa4a   : > { %v3622_v46 = vmul.f32 %v3618_v41, %v3590_v39 }
 0xa4b   : > { %v3623_v26 = vmul.f32 %v3619_v53, %v3591_v44 }
 0xa4c   : > { %v3626_v28 = vpack.c.bf16 %v3622_v46, %v3620_v16 }
 0xa4d   : > { %v3627_v29 = vpack.c.bf16 %v3623_v26, %v3621_v17 }
 0xa4f   : > { %3788 = vmatprep.mubr.bf16.mxu1 %v3627_v29 }
 0xa50   : > { %3789 = vmatmul.mubr.bf16.vlgmr.msra.gmra.mrb[0].mxu1 %v3626_v28 }
 0xb23   : > { %v4289_v62 = vpop.f32.mrb[0].mxu1 }
 0xb24   : > { %v4290_v10 = vpop.f32.mrb[1].mxu1 }
 0xb25   : > { %v4291_v22 = vadd.f32 %v4290_v10, %v4289_v62  ;;  %v4292_v59 = vpop.f32.mrb[2].mxu1  ;;  %3804 = sbr.rel (%p4216_p3) target bundleno = 3185 (0xc71), region = 134 }
 0xb26   : > { %v4293_v63 = vpop.f32.mrb[3].mxu1 }
 0xb27   : > { %v3797_v35 = vadd.f32 %v4291_v22, %v3624_v33  ;;  %v4294_v36 = vadd.f32 %v4293_v63, %v4292_v59 }
 0xb29   : > { %3799 = vst [vmem:[#allocation3] sm:$0xff] %v3797_v35  ;;  %v3798_v0 = vadd.f32 %v4294_v36, %v3625_v34 }
 0xb2b   : > { %3800 = vst [vmem:[#allocation3 + $0x8] sm:$0xff] %v3798_v0 }
 0xb30   : > { %v3805_v37 = vld [vmem:[#allocation3] sm:$0xff] }
 0xb31   : > { %v3814_v40 = vadd.f32 %v4217_v49, %v3805_v37 }
 0xb32   : > { %v3806_v38 = vld [vmem:[#allocation3 + $0x8] sm:$0xff] }
 0xb33   : > { %v3815_v45 = vadd.f32 %v4217_v49, %v3806_v38  ;;  %v3816_v47 = vadd.f32 %v3814_v40, %v5516_v24 }
 0xb35   : > { %3820 = vadd.xlane.f32.xlu0 %v3816_v47  ;;  %v3817_v48 = vadd.f32 %v3815_v45, %v5518_v25 }
 0xb39   : > { %3822 = vadd.xlane.f32.xlu0 %v3817_v48 }
 0xbc2   : > { %v3821_v50 = vpop.xlane.xlu0 %3820 }
 0xbc3   : > { %v3825_v51 = vmul.f32 0.0078125, %v3821_v50 }
 0xbc5   : > { %v3827_v55 = vsub.f32 %v3816_v47, %v3825_v51 }
 0xbc6   : > { %v3823_v6 = vpop.xlane.xlu0 %3822 }
 0xbc7   : > { %v3826_v56 = vmul.f32 0.0078125, %v3823_v6  ;;  %v3829_v54 = vmul.f32 %v3827_v55, %v3827_v55 }
 0xbc9   : > { %v3828_v57 = vsub.f32 %v3817_v48, %v3826_v56  ;;  %3831 = vadd.xlane.f32.xlu1 %v3829_v54 }
 0xbcb   : > { %v3830_v58 = vmul.f32 %v3828_v57, %v3828_v57 }
 0xbcd   : > { %3833 = vadd.xlane.f32.xlu1 %v3830_v58 }
 0xc56   : > { %v3832_v30 = vpop.xlane.xlu1 %3831 }
 0xc57   : > { %v3835_v31 = vmul.f32 0.0078125, %v3832_v30 }
 0xc59   : > { %v3837_v24 = vadd.f32 1e-12, %v3835_v31 }
 0xc5a   : > { %v3834_v19 = vpop.xlane.xlu1 %3833 }
 0xc5b   : > { %4660 = vrsqrt.f32 %v3837_v24  ;;  %v3836_v25 = vmul.f32 0.0078125, %v3834_v19 }
 0xc5d   : > { %v3838_v23 = vadd.f32 1e-12, %v3836_v25 }
 0xc5f   : > { %4662 = vrsqrt.f32 %v3838_v23 }
 0xc65   : > { %v4661_v3 = vpop.eup %4660 }
 0xc66   : > { %v3841_v2 = vmul.f32 %v4661_v3, %v3827_v55 }
 0xc68   : > { %v3849_v5 = vmul.f32 %v4218_v61, %v3841_v2 }
 0xc69   : > { %v4663_v7 = vpop.eup %4662 }
 0xc6a   : > { %v3857_v8 = vadd.f32 %v4219_v4, %v3849_v5  ;;  %v3842_v9 = vmul.f32 %v4663_v7, %v3828_v57 }
 0xc6c   : > { %3859 = vst [vmem:[%s5005_s0] sm:$0xff] %v3857_v8  ;;  %v3850_v11 = vmul.f32 %v4218_v61, %v3842_v9 }
 0xc6e   : > { %v3858_v12 = vadd.f32 %v4219_v4, %v3850_v11 }
 0xc70   : > { %3860 = vst [vmem:[%s5005_s0 + $0x8] sm:$0xff] %v3858_v12 }
 0xc71 PF: > { %s5672_s15 = sld [smem:[#allocation9_spill]]  ;;  %s5673_s21 = sld [smem:[#allocation5_spill]] }
 0xc72   : > { %s5674_s22 = sld [smem:[#allocation13_spill]]  ;;  %s5675_s23 = sld [smem:[#allocation6_spill]] }
 0xc73   : > { %s5676_s24 = sld [smem:[#allocation7_spill]]  ;;  %s5677_s25 = sld [smem:[#allocation8_spill]] }
 0xc74   : > { %s5678_s26 = sld [smem:[#allocation10_spill]]  ;;  %s5679_s27 = sld [smem:[#allocation11_spill]] }
 0xc75   : > { %s5680_s28 = sld [smem:[#allocation12_spill]] }
 0xc77   : > { %s26_s29 = sadd.s32 1, %s5672_s15  }
 0xc78   : > { %p23_p4 = scmp.ge.s32.totalorder %s26_s29, 10  }
 0xc7a   :  { %25 = sbr.rel (!%p23_p4) target bundleno = 22 (0x16), region = 208 }

</bundles_post_ra>
